<compile_context>
chip_gen: v7x
topology: tpu7x:2x2x1
jax: 0.10.0
libtpu: 0.0.40
codegen_flags: <defaults>
</compile_context>

<pallas_src>
import functools

import numpy as np
import jax
import jax.numpy as jnp
from jax import lax
from jax.experimental import pallas as pl
from jax.experimental.pallas import tpu as pltpu


def _ceil8(n: int) -> int:
    return (n + 7) // 8 * 8


def _upsample_matrix(n: int) -> np.ndarray:
    """PyTorch F.interpolate(scale_factor=2, mode='bilinear',
    align_corners=False) along one axis, as a (2n, n) matrix (reference only)."""
    m = np.zeros((2 * n, n), dtype=np.float32)
    for d in range(2 * n):
        src = max((d + 0.5) * 0.5 - 0.5, 0.0)
        i0 = min(int(np.floor(src)), n - 1)
        lam = src - i0
        i1 = min(i0 + 1, n - 1)
        m[d, i0] += 1.0 - lam
        m[d, i1] += lam
    return m


def _kernel(x_ref, w1_ref, w2_ref, o_ref, p1_ref, p2_ref,
            *, H, W, Cin, Cout, C1P, C2P):
    L = x_ref.shape[-1]                      # lane length = images_per_step*H*W
    pos = lax.broadcasted_iota(jnp.int32, (1, L), 1)

    # row/col inside each image; lane axis is the concatenation of images.
    if (W & (W - 1)) == 0:
        col = jnp.bitwise_and(pos, W - 1)
        r = jnp.right_shift(pos, W.bit_length() - 1)
    else:
        col = pos % W
        r = pos // W
    row = jnp.bitwise_and(r, H - 1) if (H & (H - 1)) == 0 else r % H

    # Boundary predicates: computed once, shared by both convs and the
    # upsample.  They also implement the conv's zero padding AND prevent taps
    # from leaking across lane-concatenated images.
    is_top, is_bot = row == 0, row == H - 1
    is_left, is_right = col == 0, col == W - 1
    row_ok = {-1: ~is_top, 0: None, 1: ~is_bot}
    col_ok = {-1: ~is_left, 0: None, 1: ~is_right}
    tap_mask = []
    for t in range(9):
        dy, dx = t // 3 - 1, t % 3 - 1
        rm, cm = row_ok[dy], col_ok[dx]
        tap_mask.append(rm if cm is None else (cm if rm is None else rm & cm))

    # Ones-row block that carries the conv bias through the MXU matmul.
    bias_blk = (lax.broadcasted_iota(jnp.int32, (8, L), 0) == 0
                ).astype(jnp.bfloat16)

    def conv3x3(x, c_in, c_pad, w_ref, p_ref):
        # im2col on the flattened lane axis: for tap (dy, dx) the patch value
        # at position p is x[p + dy*W + dx] when in bounds, else 0.  Rolls run
        # on the XLU, masks on the VPU; 9 taps + bias block feed ONE MXU
        # matmul with K = 9*c_pad + 8.  Tap stores are 8-sublane-aligned bf16.
        pad = (jnp.zeros((c_pad - c_in, L), jnp.float32)
               if c_pad > c_in else None)
        for t in range(9):
            dy, dx = t // 3 - 1, t % 3 - 1
            off = dy * W + dx
            if off == 0:
                patch = x
            else:
                shifted = pltpu.roll(x, (-off) % L, 1)
                patch = jnp.where(tap_mask[t], shifted, 0.0)
            if pad is not None:
                patch = jnp.concatenate([patch, pad], axis=0)
            p_ref[t * c_pad:(t + 1) * c_pad, :] = patch.astype(jnp.bfloat16)
        p_ref[9 * c_pad:9 * c_pad + 8, :] = bias_blk
        return jnp.dot(w_ref[...], p_ref[...],      # (Cout, K) x (K, L), bf16
                       preferred_element_type=jnp.float32)

    # conv1 (+folded BN scale/bias) + ReLU, conv2 (+folded BN) + ReLU.
    h1 = jnp.maximum(conv3x3(x_ref[...], Cin, C1P, w1_ref, p1_ref), 0.0)
    h2 = jnp.maximum(conv3x3(h1, Cout, C2P, w2_ref, p2_ref), 0.0)

    # Bilinear x2 (align_corners=False): out[2i] = .25*in[i-1] + .75*in[i],
    # out[2i+1] = .75*in[i] + .25*in[i+1], edge-clamped; separable over H, W.
    def up1d(t, clamp_lo, clamp_hi, step):
        prev = jnp.where(clamp_lo, t, pltpu.roll(t, step, 1))
        nxt = jnp.where(clamp_hi, t, pltpu.roll(t, (-step) % L, 1))
        return 0.25 * prev + 0.75 * t, 0.75 * t + 0.25 * nxt

    h_even, h_odd = up1d(h2, is_top, is_bot, W)          # along H
    for a, th in enumerate((h_even, h_odd)):
        w_even, w_odd = up1d(th, is_left, is_right, 1)   # along W
        o_ref[2 * a + 0] = w_even.astype(o_ref.dtype)
        o_ref[2 * a + 1] = w_odd.astype(o_ref.dtype)


def _default_grid_steps(N: int) -> int:
    # v7x has 2 TensorCores per chip -> 2-way parallel grid; single-TC
    # v5e/v6e amortize per-step overhead best with the whole batch in 1 step.
    try:
        kind = jax.devices()[0].device_kind.lower()
    except Exception:
        kind = ""
    if "v7" in kind and N >= 2 and N % 2 == 0:
        return 2
    return 1


def upsample_layer(x_nchw, w1m, w2m, *, grid_steps=None):
    N, Cin, H, W = x_nchw.shape
    Cout = w1m.shape[0]
    HW = H * W
    if grid_steps is None:
        grid_steps = _default_grid_steps(N)
    assert N % grid_steps == 0
    NB = N // grid_steps
    L = NB * HW
    C1P, C2P = _ceil8(Cin), _ceil8(Cout)

    # Lane-fold the batch: (N, Cin, H, W) -> (Cin, N*H*W); each grid step sees
    # NB images concatenated on the lane axis.
    x_lanes = jnp.transpose(x_nchw, (1, 0, 2, 3)).reshape(Cin, N * HW)

    kern = functools.partial(_kernel, H=H, W=W, Cin=Cin, Cout=Cout,
                             C1P=C1P, C2P=C2P)
    out = pl.pallas_call(
        kern,
        out_shape=jax.ShapeDtypeStruct((4, Cout, N * HW), x_nchw.dtype),
        grid_spec=pltpu.PrefetchScalarGridSpec(
            num_scalar_prefetch=0,
            grid=(grid_steps,),
            in_specs=[
                pl.BlockSpec((Cin, L), lambda b: (0, b)),
                pl.BlockSpec((Cout, 9 * C1P + 8), lambda b: (0, 0)),
                pl.BlockSpec((Cout, 9 * C2P + 8), lambda b: (0, 0)),
            ],
            out_specs=pl.BlockSpec((4, Cout, L), lambda b: (0, 0, b)),
            scratch_shapes=[pltpu.VMEM((9 * C1P + 8, L), jnp.bfloat16),
                            pltpu.VMEM((9 * C2P + 8, L), jnp.bfloat16)],
        ),
        compiler_params=pltpu.CompilerParams(
            dimension_semantics=("parallel",)),
    )(x_lanes, w1m, w2m)

    # (h-parity, w-parity, C, N, H, W) -> NCHW (N, C, 2H, 2W).  Pure layout
    # plumbing in the wrapper so the kernel's output stores stay lane-dense.
    out = out.reshape(2, 2, Cout, N, H, W)
    out = jnp.transpose(out, (3, 2, 4, 0, 5, 1))
    return out.reshape(N, Cout, 2 * H, 2 * W)


def _pack_weights(w_eff, b_eff, cin):
    """(Cout, Cin, 3, 3) f32 + (Cout,) f32 -> (Cout, 9*ceil8(Cin)+8) bf16,
    columns ordered (ky, kx, cin-padded) to match the im2col rows, with the
    bias carried by the first column of the trailing 8-wide ones block."""
    cout = w_eff.shape[0]
    cp = _ceil8(cin)
    wt = jnp.transpose(w_eff, (0, 2, 3, 1))                 # (Cout, 3, 3, Cin)
    wt = jnp.pad(wt, ((0, 0), (0, 0), (0, 0), (0, cp - cin)))
    wt = wt.reshape(cout, 9 * cp)
    bias_cols = jnp.zeros((cout, 8), jnp.float32).at[:, 0].set(b_eff)
    return jnp.concatenate([wt, bias_cols], axis=1).astype(jnp.bfloat16)


def init_params(key, in_ch, out_ch, eps=1e-5):
    """Deterministic synthetic parameters (conv weights/bias + eval-mode BN).
    BN scale is folded into the weights and BN shift + conv bias into a single
    bias, both snapped to bf16 so the f32 reference and the bf16-operand MXU
    kernel share identical effective parameters."""
    ks = jax.random.split(key, 12)
    w1 = 0.1 * jax.random.normal(ks[0], (out_ch, in_ch, 3, 3), jnp.float32)
    cb1 = 0.1 * jax.random.normal(ks[1], (out_ch,), jnp.float32)
    g1 = 1.0 + 0.1 * jax.random.normal(ks[2], (out_ch,), jnp.float32)
    be1 = 0.1 * jax.random.normal(ks[3], (out_ch,), jnp.float32)
    rm1 = 0.1 * jax.random.normal(ks[4], (out_ch,), jnp.float32)
    rv1 = 1.0 + 0.1 * jnp.abs(jax.random.normal(ks[5], (out_ch,), jnp.float32))

    w2 = 0.1 * jax.random.normal(ks[6], (out_ch, out_ch, 3, 3), jnp.float32)
    cb2 = 0.1 * jax.random.normal(ks[7], (out_ch,), jnp.float32)
    g2 = 1.0 + 0.1 * jax.random.normal(ks[8], (out_ch,), jnp.float32)
    be2 = 0.1 * jax.random.normal(ks[9], (out_ch,), jnp.float32)
    rm2 = 0.1 * jax.random.normal(ks[10], (out_ch,), jnp.float32)
    rv2 = 1.0 + 0.1 * jnp.abs(jax.random.normal(ks[11], (out_ch,), jnp.float32))

    s1 = g1 / jnp.sqrt(rv1 + eps)
    b1 = be1 + (cb1 - rm1) * s1
    s2 = g2 / jnp.sqrt(rv2 + eps)
    b2 = be2 + (cb2 - rm2) * s2

    # Fold the BN scale into the weights in f32, THEN snap to bf16 so the
    # reference sees exactly the kernel's MXU weights (and same for biases).
    w1_eff = (w1 * s1[:, None, None, None]).astype(jnp.bfloat16).astype(jnp.float32)
    b1_eff = b1.astype(jnp.bfloat16).astype(jnp.float32)
    w2_eff = (w2 * s2[:, None, None, None]).astype(jnp.bfloat16).astype(jnp.float32)
    b2_eff = b2.astype(jnp.bfloat16).astype(jnp.float32)

    w1m = _pack_weights(w1_eff, b1_eff, in_ch)
    w2m = _pack_weights(w2_eff, b2_eff, out_ch)
    return w1_eff, b1_eff, w2_eff, b2_eff, w1m, w2m


def reference(x, w1, b1, w2, b2, K):
    """Pure-JAX f32 NCHW reference with identical (folded-BN) semantics."""
    dn = ('NCHW', 'OIHW', 'NCHW')
    hp = lax.Precision.HIGHEST
    z1 = lax.conv_general_dilated(x, w1, (1, 1), ((1, 1), (1, 1)),
                                  dimension_numbers=dn, precision=hp)
    h1 = jnp.maximum(z1 + b1.reshape(1, -1, 1, 1), 0.)
    z2 = lax.conv_general_dilated(h1, w2, (1, 1), ((1, 1), (1, 1)),
                                  dimension_numbers=dn, precision=hp)
    h2 = jnp.maximum(z2 + b2.reshape(1, -1, 1, 1), 0.)
    N, C, H, W = h2.shape
    up = jnp.einsum('pm,ncm->ncp', K, h2.reshape(N, C, H * W), precision=hp)
    return up.reshape(N, C, 2 * H, 2 * W)


if __name__ == "__main__":
    N, in_ch, out_ch, H, W = 2, 4, 8, 16, 16   # NCHW input [2, 4, 16, 16]
    key = jax.random.PRNGKey(0)
    kx, kp = jax.random.split(key)
    x = jax.random.normal(kx, (N, in_ch, H, W), jnp.float32)

    w1_eff, b1_eff, w2_eff, b2_eff, w1m, w2m = init_params(kp, in_ch, out_ch)

    out = upsample_layer(x, w1m, w2m)
    out = jax.block_until_ready(out)

    # Reference uses the explicit (validated) PyTorch-semantics upsample matrix.
    K = jnp.asarray(np.kron(_upsample_matrix(H), _upsample_matrix(W)),
                    jnp.float32)
    ref = reference(x, w1_eff, b1_eff, w2_eff, b2_eff, K)
    # bf16 MXU activations in the kernel vs. f32 reference -> loose tolerance.
    np.testing.assert_allclose(np.asarray(out), np.asarray(ref),
                               rtol=1e-2, atol=1e-2)
    print("KERNEL_OK")
</pallas_src>

<mosaic_0001>
module attributes {stable_mosaic.version = 11 : i64} {
  func.func @_kernel(%arg0: i32, %arg1: memref<4x512xf32, #tpu.memory_space<vmem>>, %arg2: memref<8x80xbf16, #tpu.memory_space<vmem>>, %arg3: memref<8x80xbf16, #tpu.memory_space<vmem>>, %arg4: memref<4x8x512xf32, #tpu.memory_space<vmem>>, %arg5: memref<80x512xbf16, #tpu.memory_space<vmem>>, %arg6: memref<80x512xbf16, #tpu.memory_space<vmem>>) attributes {dimension_semantics = [#tpu.dimension_semantics<parallel>], iteration_bounds = array<i64: 1>, scalar_prefetch = 0 : i64, scratch_operands = 2 : i64, tpu.core_type = #tpu.core_type<tc>, window_params = [{transform_indices = @transform_0, window_bounds = array<i64: 4, 512>}, {pipeline_mode = #tpu.pipeline_mode<synchronous>, transform_indices = @transform_1, window_bounds = array<i64: 8, 80>}, {pipeline_mode = #tpu.pipeline_mode<synchronous>, transform_indices = @transform_2, window_bounds = array<i64: 8, 80>}, {transform_indices = @transform_3, window_bounds = array<i64: 4, 8, 512>}]} {
    %0 = tpu.iota {dimensions = array<i32: 1>} : vector<1x512xi32>
    %c15_i32 = arith.constant 15 : i32
    %1 = vector.broadcast %c15_i32 : i32 to vector<1x512xi32>
    %2 = arith.andi %0, %1 : vector<1x512xi32>
    %c4_i32 = arith.constant 4 : i32
    %3 = vector.broadcast %c4_i32 : i32 to vector<1x512xi32>
    %4 = arith.shrsi %0, %3 : vector<1x512xi32>
    %c15_i32_0 = arith.constant 15 : i32
    %5 = vector.broadcast %c15_i32_0 : i32 to vector<1x512xi32>
    %6 = arith.andi %4, %5 : vector<1x512xi32>
    %c0_i32 = arith.constant 0 : i32
    %7 = vector.broadcast %c0_i32 : i32 to vector<1x512xi32>
    %8 = arith.cmpi eq, %6, %7 : vector<1x512xi32>
    %c15_i32_1 = arith.constant 15 : i32
    %9 = vector.broadcast %c15_i32_1 : i32 to vector<1x512xi32>
    %10 = arith.cmpi eq, %6, %9 : vector<1x512xi32>
    %c0_i32_2 = arith.constant 0 : i32
    %11 = vector.broadcast %c0_i32_2 : i32 to vector<1x512xi32>
    %12 = arith.cmpi eq, %2, %11 : vector<1x512xi32>
    %c15_i32_3 = arith.constant 15 : i32
    %13 = vector.broadcast %c15_i32_3 : i32 to vector<1x512xi32>
    %14 = arith.cmpi eq, %2, %13 : vector<1x512xi32>
    %cst = arith.constant dense<true> : vector<1x512xi1>
    %15 = arith.xori %8, %cst : vector<1x512xi1>
    %cst_4 = arith.constant dense<true> : vector<1x512xi1>
    %16 = arith.xori %10, %cst_4 : vector<1x512xi1>
    %cst_5 = arith.constant dense<true> : vector<1x512xi1>
    %17 = arith.xori %12, %cst_5 : vector<1x512xi1>
    %cst_6 = arith.constant dense<true> : vector<1x512xi1>
    %18 = arith.xori %14, %cst_6 : vector<1x512xi1>
    %19 = arith.andi %15, %17 : vector<1x512xi1>
    %20 = arith.andi %15, %18 : vector<1x512xi1>
    %21 = arith.andi %16, %17 : vector<1x512xi1>
    %22 = arith.andi %16, %18 : vector<1x512xi1>
    %23 = tpu.iota {dimensions = array<i32: 0>} : vector<8x512xi32>
    %c0_i32_7 = arith.constant 0 : i32
    %24 = vector.broadcast %c0_i32_7 : i32 to vector<8x512xi32>
    %25 = arith.cmpi eq, %23, %24 : vector<8x512xi32>
    %26 = arith.extui %25 : vector<8x512xi1> to vector<8x512xi32>
    %27 = arith.sitofp %26 : vector<8x512xi32> to vector<8x512xf32>
    %28 = arith.truncf %27 : vector<8x512xf32> to vector<8x512xbf16>
    %c0 = arith.constant 0 : index
    %c0_8 = arith.constant 0 : index
    %29 = vector.load %arg1[%c0, %c0_8] : memref<4x512xf32, #tpu.memory_space<vmem>>, vector<4x512xf32>
    %cst_9 = arith.constant 0.000000e+00 : f32
    %30 = vector.broadcast %cst_9 : f32 to vector<4x512xf32>
    %c17_i32 = arith.constant 17 : i32
    %31 = tpu.dynamic_rotate %29 by %c17_i32 dim 1 : vector<4x512xf32>, i32 -> vector<4x512xf32>
    %cst_10 = arith.constant 0.000000e+00 : f32
    %32 = vector.shape_cast %19 : vector<1x512xi1> to vector<1x512xi1>
    %33 = vector.broadcast %32 : vector<1x512xi1> to vector<4x512xi1>
    %34 = vector.broadcast %cst_10 : f32 to vector<4x512xf32>
    %35 = arith.select %33, %31, %34 : vector<4x512xi1>, vector<4x512xf32>
    %36 = tpu.concatenate %35, %30 in 0 : vector<4x512xf32>, vector<4x512xf32> -> vector<8x512xf32>
    %37 = arith.truncf %36 : vector<8x512xf32> to vector<8x512xbf16>
    %c0_11 = arith.constant 0 : index
    %c0_12 = arith.constant 0 : index
    %38 = vector.load %arg5[%c0_11, %c0_12] : memref<80x512xbf16, #tpu.memory_space<vmem>>, vector<8x512xbf16>
    tpu.vector_store %arg5[%c0_11, %c0_12], %37 {strides = array<i32>} : memref<80x512xbf16, #tpu.memory_space<vmem>>, vector<8x512xbf16>,
    %c16_i32 = arith.constant 16 : i32
    %39 = tpu.dynamic_rotate %29 by %c16_i32 dim 1 : vector<4x512xf32>, i32 -> vector<4x512xf32>
    %cst_13 = arith.constant 0.000000e+00 : f32
    %40 = vector.shape_cast %15 : vector<1x512xi1> to vector<1x512xi1>
    %41 = vector.broadcast %40 : vector<1x512xi1> to vector<4x512xi1>
    %42 = vector.broadcast %cst_13 : f32 to vector<4x512xf32>
    %43 = arith.select %41, %39, %42 : vector<4x512xi1>, vector<4x512xf32>
    %44 = tpu.concatenate %43, %30 in 0 : vector<4x512xf32>, vector<4x512xf32> -> vector<8x512xf32>
    %45 = arith.truncf %44 : vector<8x512xf32> to vector<8x512xbf16>
    %c8 = arith.constant 8 : index
    %c0_14 = arith.constant 0 : index
    %46 = vector.load %arg5[%c8, %c0_14] : memref<80x512xbf16, #tpu.memory_space<vmem>>, vector<8x512xbf16>
    tpu.vector_store %arg5[%c8, %c0_14], %45 {strides = array<i32>} : memref<80x512xbf16, #tpu.memory_space<vmem>>, vector<8x512xbf16>,
    %c15_i32_15 = arith.constant 15 : i32
    %47 = tpu.dynamic_rotate %29 by %c15_i32_15 dim 1 : vector<4x512xf32>, i32 -> vector<4x512xf32>
    %cst_16 = arith.constant 0.000000e+00 : f32
    %48 = vector.shape_cast %20 : vector<1x512xi1> to vector<1x512xi1>
    %49 = vector.broadcast %48 : vector<1x512xi1> to vector<4x512xi1>
    %50 = vector.broadcast %cst_16 : f32 to vector<4x512xf32>
    %51 = arith.select %49, %47, %50 : vector<4x512xi1>, vector<4x512xf32>
    %52 = tpu.concatenate %51, %30 in 0 : vector<4x512xf32>, vector<4x512xf32> -> vector<8x512xf32>
    %53 = arith.truncf %52 : vector<8x512xf32> to vector<8x512xbf16>
    %c16 = arith.constant 16 : index
    %c0_17 = arith.constant 0 : index
    %54 = vector.load %arg5[%c16, %c0_17] : memref<80x512xbf16, #tpu.memory_space<vmem>>, vector<8x512xbf16>
    tpu.vector_store %arg5[%c16, %c0_17], %53 {strides = array<i32>} : memref<80x512xbf16, #tpu.memory_space<vmem>>, vector<8x512xbf16>,
    %c1_i32 = arith.constant 1 : i32
    %55 = tpu.dynamic_rotate %29 by %c1_i32 dim 1 : vector<4x512xf32>, i32 -> vector<4x512xf32>
    %cst_18 = arith.constant 0.000000e+00 : f32
    %56 = vector.shape_cast %17 : vector<1x512xi1> to vector<1x512xi1>
    %57 = vector.broadcast %56 : vector<1x512xi1> to vector<4x512xi1>
    %58 = vector.broadcast %cst_18 : f32 to vector<4x512xf32>
    %59 = arith.select %57, %55, %58 : vector<4x512xi1>, vector<4x512xf32>
    %60 = tpu.concatenate %59, %30 in 0 : vector<4x512xf32>, vector<4x512xf32> -> vector<8x512xf32>
    %61 = arith.truncf %60 : vector<8x512xf32> to vector<8x512xbf16>
    %c24 = arith.constant 24 : index
    %c0_19 = arith.constant 0 : index
    %62 = vector.load %arg5[%c24, %c0_19] : memref<80x512xbf16, #tpu.memory_space<vmem>>, vector<8x512xbf16>
    tpu.vector_store %arg5[%c24, %c0_19], %61 {strides = array<i32>} : memref<80x512xbf16, #tpu.memory_space<vmem>>, vector<8x512xbf16>,
    %63 = tpu.concatenate %29, %30 in 0 : vector<4x512xf32>, vector<4x512xf32> -> vector<8x512xf32>
    %64 = arith.truncf %63 : vector<8x512xf32> to vector<8x512xbf16>
    %c32 = arith.constant 32 : index
    %c0_20 = arith.constant 0 : index
    %65 = vector.load %arg5[%c32, %c0_20] : memref<80x512xbf16, #tpu.memory_space<vmem>>, vector<8x512xbf16>
    tpu.vector_store %arg5[%c32, %c0_20], %64 {strides = array<i32>} : memref<80x512xbf16, #tpu.memory_space<vmem>>, vector<8x512xbf16>,
    %c511_i32 = arith.constant 511 : i32
    %66 = tpu.dynamic_rotate %29 by %c511_i32 dim 1 : vector<4x512xf32>, i32 -> vector<4x512xf32>
    %cst_21 = arith.constant 0.000000e+00 : f32
    %67 = vector.shape_cast %18 : vector<1x512xi1> to vector<1x512xi1>
    %68 = vector.broadcast %67 : vector<1x512xi1> to vector<4x512xi1>
    %69 = vector.broadcast %cst_21 : f32 to vector<4x512xf32>
    %70 = arith.select %68, %66, %69 : vector<4x512xi1>, vector<4x512xf32>
    %71 = tpu.concatenate %70, %30 in 0 : vector<4x512xf32>, vector<4x512xf32> -> vector<8x512xf32>
    %72 = arith.truncf %71 : vector<8x512xf32> to vector<8x512xbf16>
    %c40 = arith.constant 40 : index
    %c0_22 = arith.constant 0 : index
    %73 = vector.load %arg5[%c40, %c0_22] : memref<80x512xbf16, #tpu.memory_space<vmem>>, vector<8x512xbf16>
    tpu.vector_store %arg5[%c40, %c0_22], %72 {strides = array<i32>} : memref<80x512xbf16, #tpu.memory_space<vmem>>, vector<8x512xbf16>,
    %c497_i32 = arith.constant 497 : i32
    %74 = tpu.dynamic_rotate %29 by %c497_i32 dim 1 : vector<4x512xf32>, i32 -> vector<4x512xf32>
    %cst_23 = arith.constant 0.000000e+00 : f32
    %75 = vector.shape_cast %21 : vector<1x512xi1> to vector<1x512xi1>
    %76 = vector.broadcast %75 : vector<1x512xi1> to vector<4x512xi1>
    %77 = vector.broadcast %cst_23 : f32 to vector<4x512xf32>
    %78 = arith.select %76, %74, %77 : vector<4x512xi1>, vector<4x512xf32>
    %79 = tpu.concatenate %78, %30 in 0 : vector<4x512xf32>, vector<4x512xf32> -> vector<8x512xf32>
    %80 = arith.truncf %79 : vector<8x512xf32> to vector<8x512xbf16>
    %c48 = arith.constant 48 : index
    %c0_24 = arith.constant 0 : index
    %81 = vector.load %arg5[%c48, %c0_24] : memref<80x512xbf16, #tpu.memory_space<vmem>>, vector<8x512xbf16>
    tpu.vector_store %arg5[%c48, %c0_24], %80 {strides = array<i32>} : memref<80x512xbf16, #tpu.memory_space<vmem>>, vector<8x512xbf16>,
    %c496_i32 = arith.constant 496 : i32
    %82 = tpu.dynamic_rotate %29 by %c496_i32 dim 1 : vector<4x512xf32>, i32 -> vector<4x512xf32>
    %cst_25 = arith.constant 0.000000e+00 : f32
    %83 = vector.shape_cast %16 : vector<1x512xi1> to vector<1x512xi1>
    %84 = vector.broadcast %83 : vector<1x512xi1> to vector<4x512xi1>
    %85 = vector.broadcast %cst_25 : f32 to vector<4x512xf32>
    %86 = arith.select %84, %82, %85 : vector<4x512xi1>, vector<4x512xf32>
    %87 = tpu.concatenate %86, %30 in 0 : vector<4x512xf32>, vector<4x512xf32> -> vector<8x512xf32>
    %88 = arith.truncf %87 : vector<8x512xf32> to vector<8x512xbf16>
    %c56 = arith.constant 56 : index
    %c0_26 = arith.constant 0 : index
    %89 = vector.load %arg5[%c56, %c0_26] : memref<80x512xbf16, #tpu.memory_space<vmem>>, vector<8x512xbf16>
    tpu.vector_store %arg5[%c56, %c0_26], %88 {strides = array<i32>} : memref<80x512xbf16, #tpu.memory_space<vmem>>, vector<8x512xbf16>,
    %c495_i32 = arith.constant 495 : i32
    %90 = tpu.dynamic_rotate %29 by %c495_i32 dim 1 : vector<4x512xf32>, i32 -> vector<4x512xf32>
    %cst_27 = arith.constant 0.000000e+00 : f32
    %91 = vector.shape_cast %22 : vector<1x512xi1> to vector<1x512xi1>
    %92 = vector.broadcast %91 : vector<1x512xi1> to vector<4x512xi1>
    %93 = vector.broadcast %cst_27 : f32 to vector<4x512xf32>
    %94 = arith.select %92, %90, %93 : vector<4x512xi1>, vector<4x512xf32>
    %95 = tpu.concatenate %94, %30 in 0 : vector<4x512xf32>, vector<4x512xf32> -> vector<8x512xf32>
    %96 = arith.truncf %95 : vector<8x512xf32> to vector<8x512xbf16>
    %c64 = arith.constant 64 : index
    %c0_28 = arith.constant 0 : index
    %97 = vector.load %arg5[%c64, %c0_28] : memref<80x512xbf16, #tpu.memory_space<vmem>>, vector<8x512xbf16>
    tpu.vector_store %arg5[%c64, %c0_28], %96 {strides = array<i32>} : memref<80x512xbf16, #tpu.memory_space<vmem>>, vector<8x512xbf16>,
    %c72 = arith.constant 72 : index
    %c0_29 = arith.constant 0 : index
    %98 = vector.load %arg5[%c72, %c0_29] : memref<80x512xbf16, #tpu.memory_space<vmem>>, vector<8x512xbf16>
    tpu.vector_store %arg5[%c72, %c0_29], %28 {strides = array<i32>} : memref<80x512xbf16, #tpu.memory_space<vmem>>, vector<8x512xbf16>,
    %c0_30 = arith.constant 0 : index
    %c0_31 = arith.constant 0 : index
    %99 = vector.load %arg2[%c0_30, %c0_31] : memref<8x80xbf16, #tpu.memory_space<vmem>>, vector<8x80xbf16>
    %c0_32 = arith.constant 0 : index
    %c0_33 = arith.constant 0 : index
    %100 = vector.load %arg5[%c0_32, %c0_33] : memref<80x512xbf16, #tpu.memory_space<vmem>>, vector<80x512xbf16>
    %cst_34 = arith.constant dense<0.000000e+00> : vector<8x512xf32>
    %101 = tpu.matmul %99, %100, %cst_34 {dimension_numbers = #tpu.dot_dimension_numbers<[1], [0], [0], [1], [0, 0, 1, 1], [], []>} : vector<8x80xbf16>, vector<80x512xbf16>, vector<8x512xf32> -> vector<8x512xf32>
    %cst_35 = arith.constant 0.000000e+00 : f32
    %102 = vector.broadcast %cst_35 : f32 to vector<8x512xf32>
    %103 = arith.maximumf %101, %102 : vector<8x512xf32>
    %c17_i32_36 = arith.constant 17 : i32
    %104 = tpu.dynamic_rotate %103 by %c17_i32_36 dim 1 : vector<8x512xf32>, i32 -> vector<8x512xf32>
    %cst_37 = arith.constant 0.000000e+00 : f32
    %105 = vector.shape_cast %19 : vector<1x512xi1> to vector<1x512xi1>
    %106 = vector.broadcast %105 : vector<1x512xi1> to vector<8x512xi1>
    %107 = vector.broadcast %cst_37 : f32 to vector<8x512xf32>
    %108 = arith.select %106, %104, %107 : vector<8x512xi1>, vector<8x512xf32>
    %109 = arith.truncf %108 : vector<8x512xf32> to vector<8x512xbf16>
    %c0_38 = arith.constant 0 : index
    %c0_39 = arith.constant 0 : index
    %110 = vector.load %arg6[%c0_38, %c0_39] : memref<80x512xbf16, #tpu.memory_space<vmem>>, vector<8x512xbf16>
    tpu.vector_store %arg6[%c0_38, %c0_39], %109 {strides = array<i32>} : memref<80x512xbf16, #tpu.memory_space<vmem>>, vector<8x512xbf16>,
    %c16_i32_40 = arith.constant 16 : i32
    %111 = tpu.dynamic_rotate %103 by %c16_i32_40 dim 1 : vector<8x512xf32>, i32 -> vector<8x512xf32>
    %cst_41 = arith.constant 0.000000e+00 : f32
    %112 = vector.shape_cast %15 : vector<1x512xi1> to vector<1x512xi1>
    %113 = vector.broadcast %112 : vector<1x512xi1> to vector<8x512xi1>
    %114 = vector.broadcast %cst_41 : f32 to vector<8x512xf32>
    %115 = arith.select %113, %111, %114 : vector<8x512xi1>, vector<8x512xf32>
    %116 = arith.truncf %115 : vector<8x512xf32> to vector<8x512xbf16>
    %c8_42 = arith.constant 8 : index
    %c0_43 = arith.constant 0 : index
    %117 = vector.load %arg6[%c8_42, %c0_43] : memref<80x512xbf16, #tpu.memory_space<vmem>>, vector<8x512xbf16>
    tpu.vector_store %arg6[%c8_42, %c0_43], %116 {strides = array<i32>} : memref<80x512xbf16, #tpu.memory_space<vmem>>, vector<8x512xbf16>,
    %c15_i32_44 = arith.constant 15 : i32
    %118 = tpu.dynamic_rotate %103 by %c15_i32_44 dim 1 : vector<8x512xf32>, i32 -> vector<8x512xf32>
    %cst_45 = arith.constant 0.000000e+00 : f32
    %119 = vector.shape_cast %20 : vector<1x512xi1> to vector<1x512xi1>
    %120 = vector.broadcast %119 : vector<1x512xi1> to vector<8x512xi1>
    %121 = vector.broadcast %cst_45 : f32 to vector<8x512xf32>
    %122 = arith.select %120, %118, %121 : vector<8x512xi1>, vector<8x512xf32>
    %123 = arith.truncf %122 : vector<8x512xf32> to vector<8x512xbf16>
    %c16_46 = arith.constant 16 : index
    %c0_47 = arith.constant 0 : index
    %124 = vector.load %arg6[%c16_46, %c0_47] : memref<80x512xbf16, #tpu.memory_space<vmem>>, vector<8x512xbf16>
    tpu.vector_store %arg6[%c16_46, %c0_47], %123 {strides = array<i32>} : memref<80x512xbf16, #tpu.memory_space<vmem>>, vector<8x512xbf16>,
    %c1_i32_48 = arith.constant 1 : i32
    %125 = tpu.dynamic_rotate %103 by %c1_i32_48 dim 1 : vector<8x512xf32>, i32 -> vector<8x512xf32>
    %cst_49 = arith.constant 0.000000e+00 : f32
    %126 = vector.shape_cast %17 : vector<1x512xi1> to vector<1x512xi1>
    %127 = vector.broadcast %126 : vector<1x512xi1> to vector<8x512xi1>
    %128 = vector.broadcast %cst_49 : f32 to vector<8x512xf32>
    %129 = arith.select %127, %125, %128 : vector<8x512xi1>, vector<8x512xf32>
    %130 = arith.truncf %129 : vector<8x512xf32> to vector<8x512xbf16>
    %c24_50 = arith.constant 24 : index
    %c0_51 = arith.constant 0 : index
    %131 = vector.load %arg6[%c24_50, %c0_51] : memref<80x512xbf16, #tpu.memory_space<vmem>>, vector<8x512xbf16>
    tpu.vector_store %arg6[%c24_50, %c0_51], %130 {strides = array<i32>} : memref<80x512xbf16, #tpu.memory_space<vmem>>, vector<8x512xbf16>,
    %132 = arith.truncf %103 : vector<8x512xf32> to vector<8x512xbf16>
    %c32_52 = arith.constant 32 : index
    %c0_53 = arith.constant 0 : index
    %133 = vector.load %arg6[%c32_52, %c0_53] : memref<80x512xbf16, #tpu.memory_space<vmem>>, vector<8x512xbf16>
    tpu.vector_store %arg6[%c32_52, %c0_53], %132 {strides = array<i32>} : memref<80x512xbf16, #tpu.memory_space<vmem>>, vector<8x512xbf16>,
    %c511_i32_54 = arith.constant 511 : i32
    %134 = tpu.dynamic_rotate %103 by %c511_i32_54 dim 1 : vector<8x512xf32>, i32 -> vector<8x512xf32>
    %cst_55 = arith.constant 0.000000e+00 : f32
    %135 = vector.shape_cast %18 : vector<1x512xi1> to vector<1x512xi1>
    %136 = vector.broadcast %135 : vector<1x512xi1> to vector<8x512xi1>
    %137 = vector.broadcast %cst_55 : f32 to vector<8x512xf32>
    %138 = arith.select %136, %134, %137 : vector<8x512xi1>, vector<8x512xf32>
    %139 = arith.truncf %138 : vector<8x512xf32> to vector<8x512xbf16>
    %c40_56 = arith.constant 40 : index
    %c0_57 = arith.constant 0 : index
    %140 = vector.load %arg6[%c40_56, %c0_57] : memref<80x512xbf16, #tpu.memory_space<vmem>>, vector<8x512xbf16>
    tpu.vector_store %arg6[%c40_56, %c0_57], %139 {strides = array<i32>} : memref<80x512xbf16, #tpu.memory_space<vmem>>, vector<8x512xbf16>,
    %c497_i32_58 = arith.constant 497 : i32
    %141 = tpu.dynamic_rotate %103 by %c497_i32_58 dim 1 : vector<8x512xf32>, i32 -> vector<8x512xf32>
    %cst_59 = arith.constant 0.000000e+00 : f32
    %142 = vector.shape_cast %21 : vector<1x512xi1> to vector<1x512xi1>
    %143 = vector.broadcast %142 : vector<1x512xi1> to vector<8x512xi1>
    %144 = vector.broadcast %cst_59 : f32 to vector<8x512xf32>
    %145 = arith.select %143, %141, %144 : vector<8x512xi1>, vector<8x512xf32>
    %146 = arith.truncf %145 : vector<8x512xf32> to vector<8x512xbf16>
    %c48_60 = arith.constant 48 : index
    %c0_61 = arith.constant 0 : index
    %147 = vector.load %arg6[%c48_60, %c0_61] : memref<80x512xbf16, #tpu.memory_space<vmem>>, vector<8x512xbf16>
    tpu.vector_store %arg6[%c48_60, %c0_61], %146 {strides = array<i32>} : memref<80x512xbf16, #tpu.memory_space<vmem>>, vector<8x512xbf16>,
    %c496_i32_62 = arith.constant 496 : i32
    %148 = tpu.dynamic_rotate %103 by %c496_i32_62 dim 1 : vector<8x512xf32>, i32 -> vector<8x512xf32>
    %cst_63 = arith.constant 0.000000e+00 : f32
    %149 = vector.shape_cast %16 : vector<1x512xi1> to vector<1x512xi1>
    %150 = vector.broadcast %149 : vector<1x512xi1> to vector<8x512xi1>
    %151 = vector.broadcast %cst_63 : f32 to vector<8x512xf32>
    %152 = arith.select %150, %148, %151 : vector<8x512xi1>, vector<8x512xf32>
    %153 = arith.truncf %152 : vector<8x512xf32> to vector<8x512xbf16>
    %c56_64 = arith.constant 56 : index
    %c0_65 = arith.constant 0 : index
    %154 = vector.load %arg6[%c56_64, %c0_65] : memref<80x512xbf16, #tpu.memory_space<vmem>>, vector<8x512xbf16>
    tpu.vector_store %arg6[%c56_64, %c0_65], %153 {strides = array<i32>} : memref<80x512xbf16, #tpu.memory_space<vmem>>, vector<8x512xbf16>,
    %c495_i32_66 = arith.constant 495 : i32
    %155 = tpu.dynamic_rotate %103 by %c495_i32_66 dim 1 : vector<8x512xf32>, i32 -> vector<8x512xf32>
    %cst_67 = arith.constant 0.000000e+00 : f32
    %156 = vector.shape_cast %22 : vector<1x512xi1> to vector<1x512xi1>
    %157 = vector.broadcast %156 : vector<1x512xi1> to vector<8x512xi1>
    %158 = vector.broadcast %cst_67 : f32 to vector<8x512xf32>
    %159 = arith.select %157, %155, %158 : vector<8x512xi1>, vector<8x512xf32>
    %160 = arith.truncf %159 : vector<8x512xf32> to vector<8x512xbf16>
    %c64_68 = arith.constant 64 : index
    %c0_69 = arith.constant 0 : index
    %161 = vector.load %arg6[%c64_68, %c0_69] : memref<80x512xbf16, #tpu.memory_space<vmem>>, vector<8x512xbf16>
    tpu.vector_store %arg6[%c64_68, %c0_69], %160 {strides = array<i32>} : memref<80x512xbf16, #tpu.memory_space<vmem>>, vector<8x512xbf16>,
    %c72_70 = arith.constant 72 : index
    %c0_71 = arith.constant 0 : index
    %162 = vector.load %arg6[%c72_70, %c0_71] : memref<80x512xbf16, #tpu.memory_space<vmem>>, vector<8x512xbf16>
    tpu.vector_store %arg6[%c72_70, %c0_71], %28 {strides = array<i32>} : memref<80x512xbf16, #tpu.memory_space<vmem>>, vector<8x512xbf16>,
    %c0_72 = arith.constant 0 : index
    %c0_73 = arith.constant 0 : index
    %163 = vector.load %arg3[%c0_72, %c0_73] : memref<8x80xbf16, #tpu.memory_space<vmem>>, vector<8x80xbf16>
    %c0_74 = arith.constant 0 : index
    %c0_75 = arith.constant 0 : index
    %164 = vector.load %arg6[%c0_74, %c0_75] : memref<80x512xbf16, #tpu.memory_space<vmem>>, vector<80x512xbf16>
    %cst_76 = arith.constant dense<0.000000e+00> : vector<8x512xf32>
    %165 = tpu.matmul %163, %164, %cst_76 {dimension_numbers = #tpu.dot_dimension_numbers<[1], [0], [0], [1], [0, 0, 1, 1], [], []>} : vector<8x80xbf16>, vector<80x512xbf16>, vector<8x512xf32> -> vector<8x512xf32>
    %cst_77 = arith.constant 0.000000e+00 : f32
    %166 = vector.broadcast %cst_77 : f32 to vector<8x512xf32>
    %167 = arith.maximumf %165, %166 : vector<8x512xf32>
    %c16_i32_78 = arith.constant 16 : i32
    %168 = tpu.dynamic_rotate %167 by %c16_i32_78 dim 1 : vector<8x512xf32>, i32 -> vector<8x512xf32>
    %169 = vector.shape_cast %8 : vector<1x512xi1> to vector<1x512xi1>
    %170 = vector.broadcast %169 : vector<1x512xi1> to vector<8x512xi1>
    %171 = arith.select %170, %167, %168 : vector<8x512xi1>, vector<8x512xf32>
    %c496_i32_79 = arith.constant 496 : i32
    %172 = tpu.dynamic_rotate %167 by %c496_i32_79 dim 1 : vector<8x512xf32>, i32 -> vector<8x512xf32>
    %173 = vector.shape_cast %10 : vector<1x512xi1> to vector<1x512xi1>
    %174 = vector.broadcast %173 : vector<1x512xi1> to vector<8x512xi1>
    %175 = arith.select %174, %167, %172 : vector<8x512xi1>, vector<8x512xf32>
    %cst_80 = arith.constant 2.500000e-01 : f32
    %176 = vector.broadcast %cst_80 : f32 to vector<8x512xf32>
    %177 = arith.mulf %176, %171 : vector<8x512xf32>
    %cst_81 = arith.constant 7.500000e-01 : f32
    %178 = vector.broadcast %cst_81 : f32 to vector<8x512xf32>
    %179 = arith.mulf %178, %167 : vector<8x512xf32>
    %180 = arith.addf %177, %179 : vector<8x512xf32>
    %cst_82 = arith.constant 7.500000e-01 : f32
    %181 = vector.broadcast %cst_82 : f32 to vector<8x512xf32>
    %182 = arith.mulf %181, %167 : vector<8x512xf32>
    %cst_83 = arith.constant 2.500000e-01 : f32
    %183 = vector.broadcast %cst_83 : f32 to vector<8x512xf32>
    %184 = arith.mulf %183, %175 : vector<8x512xf32>
    %185 = arith.addf %182, %184 : vector<8x512xf32>
    %c1_i32_84 = arith.constant 1 : i32
    %186 = tpu.dynamic_rotate %180 by %c1_i32_84 dim 1 : vector<8x512xf32>, i32 -> vector<8x512xf32>
    %187 = vector.shape_cast %12 : vector<1x512xi1> to vector<1x512xi1>
    %188 = vector.broadcast %187 : vector<1x512xi1> to vector<8x512xi1>
    %189 = arith.select %188, %180, %186 : vector<8x512xi1>, vector<8x512xf32>
    %c511_i32_85 = arith.constant 511 : i32
    %190 = tpu.dynamic_rotate %180 by %c511_i32_85 dim 1 : vector<8x512xf32>, i32 -> vector<8x512xf32>
    %191 = vector.shape_cast %14 : vector<1x512xi1> to vector<1x512xi1>
    %192 = vector.broadcast %191 : vector<1x512xi1> to vector<8x512xi1>
    %193 = arith.select %192, %180, %190 : vector<8x512xi1>, vector<8x512xf32>
    %cst_86 = arith.constant 2.500000e-01 : f32
    %194 = vector.broadcast %cst_86 : f32 to vector<8x512xf32>
    %195 = arith.mulf %194, %189 : vector<8x512xf32>
    %cst_87 = arith.constant 7.500000e-01 : f32
    %196 = vector.broadcast %cst_87 : f32 to vector<8x512xf32>
    %197 = arith.mulf %196, %180 : vector<8x512xf32>
    %198 = arith.addf %195, %197 : vector<8x512xf32>
    %cst_88 = arith.constant 7.500000e-01 : f32
    %199 = vector.broadcast %cst_88 : f32 to vector<8x512xf32>
    %200 = arith.mulf %199, %180 : vector<8x512xf32>
    %cst_89 = arith.constant 2.500000e-01 : f32
    %201 = vector.broadcast %cst_89 : f32 to vector<8x512xf32>
    %202 = arith.mulf %201, %193 : vector<8x512xf32>
    %203 = arith.addf %200, %202 : vector<8x512xf32>
    %c0_90 = arith.constant 0 : index
    %c0_91 = arith.constant 0 : index
    %c0_92 = arith.constant 0 : index
    %204 = vector.load %arg4[%c0_90, %c0_91, %c0_92] : memref<4x8x512xf32, #tpu.memory_space<vmem>>, vector<1x8x512xf32>
    %205 = vector.shape_cast %204 : vector<1x8x512xf32> to vector<8x512xf32>
    %206 = vector.shape_cast %198 : vector<8x512xf32> to vector<1x8x512xf32>
    tpu.vector_store %arg4[%c0_90, %c0_91, %c0_92], %206 {strides = array<i32>} : memref<4x8x512xf32, #tpu.memory_space<vmem>>, vector<1x8x512xf32>,
    %c1 = arith.constant 1 : index
    %c0_93 = arith.constant 0 : index
    %c0_94 = arith.constant 0 : index
    %207 = vector.load %arg4[%c1, %c0_93, %c0_94] : memref<4x8x512xf32, #tpu.memory_space<vmem>>, vector<1x8x512xf32>
    %208 = vector.shape_cast %207 : vector<1x8x512xf32> to vector<8x512xf32>
    %209 = vector.shape_cast %203 : vector<8x512xf32> to vector<1x8x512xf32>
    tpu.vector_store %arg4[%c1, %c0_93, %c0_94], %209 {strides = array<i32>} : memref<4x8x512xf32, #tpu.memory_space<vmem>>, vector<1x8x512xf32>,
    %c1_i32_95 = arith.constant 1 : i32
    %210 = tpu.dynamic_rotate %185 by %c1_i32_95 dim 1 : vector<8x512xf32>, i32 -> vector<8x512xf32>
    %211 = vector.shape_cast %12 : vector<1x512xi1> to vector<1x512xi1>
    %212 = vector.broadcast %211 : vector<1x512xi1> to vector<8x512xi1>
    %213 = arith.select %212, %185, %210 : vector<8x512xi1>, vector<8x512xf32>
    %c511_i32_96 = arith.constant 511 : i32
    %214 = tpu.dynamic_rotate %185 by %c511_i32_96 dim 1 : vector<8x512xf32>, i32 -> vector<8x512xf32>
    %215 = vector.shape_cast %14 : vector<1x512xi1> to vector<1x512xi1>
    %216 = vector.broadcast %215 : vector<1x512xi1> to vector<8x512xi1>
    %217 = arith.select %216, %185, %214 : vector<8x512xi1>, vector<8x512xf32>
    %cst_97 = arith.constant 2.500000e-01 : f32
    %218 = vector.broadcast %cst_97 : f32 to vector<8x512xf32>
    %219 = arith.mulf %218, %213 : vector<8x512xf32>
    %cst_98 = arith.constant 7.500000e-01 : f32
    %220 = vector.broadcast %cst_98 : f32 to vector<8x512xf32>
    %221 = arith.mulf %220, %185 : vector<8x512xf32>
    %222 = arith.addf %219, %221 : vector<8x512xf32>
    %cst_99 = arith.constant 7.500000e-01 : f32
    %223 = vector.broadcast %cst_99 : f32 to vector<8x512xf32>
    %224 = arith.mulf %223, %185 : vector<8x512xf32>
    %cst_100 = arith.constant 2.500000e-01 : f32
    %225 = vector.broadcast %cst_100 : f32 to vector<8x512xf32>
    %226 = arith.mulf %225, %217 : vector<8x512xf32>
    %227 = arith.addf %224, %226 : vector<8x512xf32>
    %c2 = arith.constant 2 : index
    %c0_101 = arith.constant 0 : index
    %c0_102 = arith.constant 0 : index
    %228 = vector.load %arg4[%c2, %c0_101, %c0_102] : memref<4x8x512xf32, #tpu.memory_space<vmem>>, vector<1x8x512xf32>
    %229 = vector.shape_cast %228 : vector<1x8x512xf32> to vector<8x512xf32>
    %230 = vector.shape_cast %222 : vector<8x512xf32> to vector<1x8x512xf32>
    tpu.vector_store %arg4[%c2, %c0_101, %c0_102], %230 {strides = array<i32>} : memref<4x8x512xf32, #tpu.memory_space<vmem>>, vector<1x8x512xf32>,
    %c3 = arith.constant 3 : index
    %c0_103 = arith.constant 0 : index
    %c0_104 = arith.constant 0 : index
    %231 = vector.load %arg4[%c3, %c0_103, %c0_104] : memref<4x8x512xf32, #tpu.memory_space<vmem>>, vector<1x8x512xf32>
    %232 = vector.shape_cast %231 : vector<1x8x512xf32> to vector<8x512xf32>
    %233 = vector.shape_cast %227 : vector<8x512xf32> to vector<1x8x512xf32>
    tpu.vector_store %arg4[%c3, %c0_103, %c0_104], %233 {strides = array<i32>} : memref<4x8x512xf32, #tpu.memory_space<vmem>>, vector<1x8x512xf32>,
    return
  }
  func.func @transform_0(%arg0: i32) -> (i32, i32) {
    %c0_i32 = arith.constant 0 : i32
    %c0_i32_0 = arith.constant 0 : i32
    return %c0_i32, %arg0 : i32, i32
  }
  func.func @transform_1(%arg0: i32) -> (i32, i32) {
    %c0_i32 = arith.constant 0 : i32
    %c0_i32_0 = arith.constant 0 : i32
    %c0_i32_1 = arith.constant 0 : i32
    return %c0_i32, %c0_i32_0 : i32, i32
  }
  func.func @transform_2(%arg0: i32) -> (i32, i32) {
    %c0_i32 = arith.constant 0 : i32
    %c0_i32_0 = arith.constant 0 : i32
    %c0_i32_1 = arith.constant 0 : i32
    return %c0_i32, %c0_i32_0 : i32, i32
  }
  func.func @transform_3(%arg0: i32) -> (i32, i32, i32) {
    %c0_i32 = arith.constant 0 : i32
    %c0_i32_0 = arith.constant 0 : i32
    %c0_i32_1 = arith.constant 0 : i32
    return %c0_i32, %c0_i32_0, %arg0 : i32, i32, i32
  }
}

</mosaic_0001>

<bundles_post_ra>
// kernel: tpu_custom_call.1
= control target key start
LH: loop header
LB: loop body
LE: loop exit
PB: predicated region body
PF: predicated region fallthrough
CT: control target
= control target key end

     0   :  { %8 = vsyncpa [#allocation5], 0  ;;  %s2378_s0 = inlined_call_operand.hbm [shape: f32[4,512], index: 0, kind: input, shape index: {}]   ;;  %s2379_s1 = inlined_call_operand.hbm [shape: bf16[8,80], index: 1, kind: input, shape index: {}]   ;;  %s2380_s2 = inlined_call_operand.vmem [shape: bf16[8,80], index: 2, kind: input, shape index: {}]   ;;  %s2381_s3 = inlined_call_operand.hbm [shape: f32[4,8,512], index: 3, kind: output, shape index: {}]  }
   0x1   :  { %9 = vsyncpa [#allocation8], 0 }
   0x2   :  { %10 = vsyncpa [#allocation6], 0  ;;  %s1436_s12 = smov [#allocation4]   ;;  %s1437_s14 = smov [#allocation7]  }
   0x3   :  { %s17_s13 = sshll.u32 %s1436_s12, 4  ;;  %s27_s15 = sshll.u32 %s1437_s14, 4  ;;  %s18_s13 = int_to_ptr.vmem [resolvable:$true] %s17_s13  ;;  %s28_s15 = int_to_ptr.vmem [resolvable:$true] %s27_s15 }
   0x4   :  { %s1364_s18 = scalar_lea.hbm %s2378_s0, 256 }
   0x5   :  { %p1365_p0 = scmp.ne.s32.totalorder %s2378_s0, %s1364_s18  ;;  %p1368_p1 = scmp.lt.u32.totalorder %s1364_s18, %s2378_s0 }
   0x7   :  { %p1370_p2 = pnand %p1368_p1, %p1365_p0 }
   0x9   :  { %1373 = shalt.err (!%p1370_p2)
}
   0xa   :  { %s1374_s23 = scalar_lea.vmem %s18_s13, 256  ;;  %p1379_p4 = scmp.lt.s32.totalorder %s18_s13, %s18_s13 }
   0xb   :  { %p1375_p3 = scmp.ne.s32.totalorder %s18_s13, %s1374_s23  ;;  %p1380_p5 = scmp.lt.s32.totalorder %s1374_s23, %s1374_s23 }
   0xd   :  { %p1381_p6 = por %p1380_p5, %p1379_p4 }
   0xf   :  { %p1382_p7 = pnand %p1381_p6, %p1375_p3 }
  0x11   :  { %1385 = shalt.err (!%p1382_p7)
}
  0x12   :  { %20 = dma.hbm_to_vmem [thread:$0]  %s2378_s0, 256, %s18_s13, [#allocation5]  }
  0x13   :  { %s1386_s28 = scalar_lea.hbm %s2379_s1, 64 }
  0x14   :  { %p1387_p8 = scmp.ne.s32.totalorder %s2379_s1, %s1386_s28  ;;  %p1390_p9 = scmp.lt.u32.totalorder %s1386_s28, %s2379_s1 }
  0x16   :  { %p1392_p10 = pnand %p1390_p9, %p1387_p8 }
  0x18   :  { %1395 = shalt.err (!%p1392_p10)
}
  0x19   :  { %s1396_s6 = scalar_lea.vmem %s28_s15, 64  ;;  %p1401_p12 = scmp.lt.s32.totalorder %s28_s15, %s28_s15 }
  0x1a   :  { %p1397_p11 = scmp.ne.s32.totalorder %s28_s15, %s1396_s6  ;;  %p1402_p13 = scmp.lt.s32.totalorder %s1396_s6, %s1396_s6 }
  0x1c   :  { %p1403_p0 = por %p1402_p13, %p1401_p12 }
  0x1e   :  { %p1404_p1 = pnand %p1403_p0, %p1397_p11 }
  0x20   :  { %1407 = shalt.err (!%p1404_p1)
}
  0x21   :  { %30 = dma.hbm_to_vmem [thread:$0]  %s2379_s1, 64, %s28_s15, [#allocation8]  }
  0x22   :  { %1430 = dma.done.wait [#allocation5], 256  }
  0x23   :  { %1431 = vsyncadd [#allocation5], 4294967040 }
  0x24   :  { %1432 = dma.done.wait [#allocation8], 64  }
  0x25   :  { %1433 = vsyncadd [#allocation8], 4294967232  ;;  %v111_v0 = vld [vmem:[#allocation4] sm:$0xff]  ;;  %v112_v1 = vld [vmem:[#allocation4 + $0x8] sm:$0xff]  ;;  %s1438_s8 = smov 17   ;;  %s1439_s9 = smov 16   ;;  %v40_v14 = vlaneseq }
  0x26   :  { %v115_v2 = vcombine.high %v111_v0, %v111_v0  ;;  %v116_v3 = vcombine.high %v112_v1, %v112_v1  ;;  %s1440_s1 = smov 1   ;;  %s1441_s10 = smov 15   ;;  %vm2384_vm0 = vcmask 1043456   ;;  %v1446_v16 = vmov 0.0  }
  0x27   :  { %s1442_s11 = smov 127   ;;  %s1443_s12 = smov 112   ;;  %v292_v8 = vsel %vm2384_vm0, %v111_v0, 0.0  ;;  %v294_v9 = vsel %vm2384_vm0, %v112_v1, 0.0  ;;  %v106_v15 = vshrl.u32 %v40_v14, 7  ;;  %v1447_v20 = vmov 0  }
  0x28   :  { %v1212_v4 = vpack.i.bf16 %v115_v2, %v111_v0  ;;  %v1217_v5 = vpack.i.bf16 %v116_v3, %v112_v1  ;;  %v293_v6 = vsel %vm2384_vm0, %v115_v2, 0.0  ;;  %v295_v7 = vsel %vm2384_vm0, %v116_v3, 0.0  ;;  %s1444_s13 = smov 113   ;;  %s1445_s14 = smov 111   ;;  %540 = vmatprep.mubr.bf16.mxu0 %v1447_v20  ;;  %581 = vmatprep.mubr.bf16.mxu1 %v1447_v20 }
  0x29   :  { %v297_v10 = vpack.c.bf16 %v293_v6, %v293_v6  ;;  %v299_v11 = vpack.c.bf16 %v295_v7, %v295_v7  ;;  %v296_v12 = vpack.c.bf16 %v292_v8, %v292_v8  ;;  %v298_v13 = vpack.c.bf16 %v294_v9, %v294_v9 }
  0x2a   :  { %1213 = vrot.lane.b32.xlu1 %v1212_v4, %s1438_s8  ;;  %1203 = vrot.lane.b32.xlu0 %v1212_v4, %s1439_s9  ;;  %vm107_vm1 = vcmp.eq.s32.totalorder %v106_v15, 0  ;;  %v1518_v21 = vand.u32 127, %v40_v14  ;;  %v2436_v34 = vmov 0  ;;  %v2438_v35 = vmov 0 }
  0x2b   :  { %301 = vst [vmem:[#allocation2 + $0x48] sm:$0xf] %v297_v10  ;;  %303 = vst [vmem:[#allocation2 + $0x58] sm:$0xf] %v299_v11  ;;  %v1181_v17 = vsel %vm107_vm1, 1.0, %v1446_v16  ;;  %vm2389_vm6 = vmmov 1  }
  0x2c   :  { %300 = vst [vmem:[#allocation2 + $0x40] sm:$0xf] %v296_v12  ;;  %302 = vst [vmem:[#allocation2 + $0x50] sm:$0xf] %v298_v13  ;;  %v110_v18 = vpack.c.bf16 %v1181_v17, %v1181_v17  ;;  %v42_v22 = vadd.s32 128, %v1518_v21  ;;  %v1522_v24 = vadd.s32 256, %v1518_v21 }
  0x2d   :  { %v44_v25 = vadd.s32 384, %v1518_v21  ;;  %v49_v26 = vshra.s32 %v1518_v21, 4  ;;  %v45_v27 = vand.u32 15, %v1518_v21  ;;  %v2440_v38 = vmov 0 }
  0x2e   :  { %1218 = vrot.lane.b32.xlu1 %v1217_v5, %s1438_s8  ;;  %1208 = vrot.lane.b32.xlu0 %v1217_v5, %s1439_s9  ;;  %v477_v19 = vrot.slane %v110_v18, 4  ;;  %v50_v23 = vshra.s32 %v42_v22, 4  ;;  %v46_v28 = vand.u32 15, %v42_v22  ;;  %v51_v30 = vshra.s32 %v1522_v24, 4 }
  0x2f   :  { %v52_v31 = vshra.s32 %v44_v25, 4  ;;  %v1530_v32 = vand.u32 15, %v49_v26  ;;  %v47_v33 = vand.u32 15, %v1522_v24  ;;  %vm1533_vm2 = vcmp.eq.s32.totalorder %v45_v27, 0 }
  0x30   :  { %480 = vst [vmem:[#allocation2 + $0x88] sm:$0xf0] %v477_v19  ;;  %479 = vst [vmem:[#allocation2 + $0x80] sm:$0xf0] %v477_v19  ;;  %v1527_v29 = vand.u32 15, %v50_v23  ;;  %v2437_v34 = vsel %vm1533_vm2, 4294967295, %v2436_v34 }
  0x31   :  { %481 = vst [vmem:[#allocation2 + $0x90] sm:$0xf0] %v477_v19  ;;  %482 = vst [vmem:[#allocation2 + $0x98] sm:$0xf0] %v477_v19  ;;  %vm1537_vm3 = vcmp.eq.s32.totalorder %v46_v28, 0  ;;  %v1542_v36 = vand.u32 15, %v51_v30 }
  0x32   :  { %1228 = vrot.lane.b32.xlu1 %v1217_v5, %s1440_s1  ;;  %1223 = vrot.lane.b32.xlu0 %v1212_v4, %s1440_s1  ;;  %842 = vst [vmem:[#allocation3 + $0x80] sm:$0xf0] %v477_v19  ;;  %843 = vst [vmem:[#allocation3 + $0x88] sm:$0xf0] %v477_v19  ;;  %v2439_v35 = vsel %vm1537_vm3, 4294967295, %v2438_v35  ;;  %vm2383_vm4 = vcmp.eq.s32.totalorder %v1527_v29, 0 }
  0x33   :  { %844 = vst [vmem:[#allocation3 + $0x90] sm:$0xf0] %v477_v19  ;;  %845 = vst [vmem:[#allocation3 + $0x98] sm:$0xf0] %v477_v19  ;;  %v1544_v37 = vand.u32 15, %v52_v31  ;;  %vm2382_vm5 = vcmp.eq.s32.totalorder %v1530_v32, 0 }
  0x34   :  { %vm1550_vm7 = vmxor %vm1533_vm2, %vm2389_vm6  ;;  %v2442_v39 = vmov 0  ;;  %v48_v40 = vand.u32 15, %v44_v25  ;;  %vm1561_vm9 = vcmp.eq.s32.totalorder %v47_v33, 0  ;;  %v2444_v41 = vmov 0 }
  0x35   :  { %v2441_v38 = vsel %vm1550_vm7, 4294967295, %v2440_v38  ;;  %vm1557_vm8 = vmxor %vm1537_vm3, %vm2389_vm6  ;;  %v2445_v41 = vsel %vm1561_vm9, 4294967295, %v2444_v41  ;;  %v2446_v42 = vmov 0  ;;  %vm2385_vm11 = vcmp.eq.s32.totalorder %v1542_v36, 0 }
  0x36   :  { %1238 = vrot.lane.b32.xlu1 %v1217_v5, %s1441_s10  ;;  %1233 = vrot.lane.b32.xlu0 %v1212_v4, %s1441_s10  ;;  %v2443_v39 = vsel %vm1557_vm8, 4294967295, %v2442_v39  ;;  %vm1568_vm10 = vmxor %vm2383_vm4, %vm2389_vm6  ;;  %v2448_v43 = vmov 0  ;;  %vm2386_vm13 = vcmp.eq.s32.totalorder %v1544_v37, 0  ;;  %vm1592_vm1 = vcmp.eq.s32.totalorder %v48_v40, 0 }
  0x37   :  { %v2447_v42 = vsel %vm1568_vm10, 4294967295, %v2446_v42  ;;  %vm1576_vm12 = vmxor %vm2382_vm5, %vm2389_vm6  ;;  %v2452_v45 = vmov 0  ;;  %vm2391_vm5 = vcmp.lt.s32.totalorder %v1518_v21, 17  ;;  %v2454_v48 = vmov 0 }
  0x38   :  { %v2449_v43 = vsel %vm1576_vm12, 4294967295, %v2448_v43  ;;  %vm1584_vm14 = vmxor %vm1561_vm9, %vm2389_vm6  ;;  %v2453_v45 = vsel %vm1592_vm1, 4294967295, %v2452_v45  ;;  %v2456_v53 = vmov 0  ;;  %v2458_v54 = vmov 0 }
  0x39   :  { %vm1601_vm0 = vmxor %vm2385_vm11, %vm2389_vm6  ;;  %vm2460_vm11 = vcmp.lt.s32.totalorder %v1518_v21, 16  ;;  %v2462_v61 = vmov 0  ;;  %v2466_v6 = vmov 0  ;;  %v2471_v10 = vmov 0 }
  0x3a   :  { %1248 = vrot.lane.b32.xlu1 %v1217_v5, %s1442_s11  ;;  %1243 = vrot.lane.b32.xlu0 %v1212_v4, %s1442_s11  ;;  %v2455_v48 = vsel %vm1601_vm0, 4294967295, %v2454_v48  ;;  %vm1608_vm15 = vmxor %vm2386_vm13, %vm2389_vm6  ;;  %vm2464_vm13 = vcmask 1043456   ;;  %vm1663_vm2 = vcmp.eq.s32.totalorder %v47_v33, 15  ;;  %v2473_v11 = vmov 0 }
  0x3b   :  { %v2457_v53 = vsel %vm1608_vm15, 4294967295, %v2456_v53  ;;  %vm1615_vm4 = vmxor %vm1592_vm1, %vm2389_vm6  ;;  %vm2468_vm6 = vcmp.lt.s32.totalorder %v1518_v21, 17  ;;  %v2474_v11 = vsel %vm1663_vm2, 4294967295, %v2473_v11  ;;  %vm2478_vm3 = vcmask 1043456  }
  0x3c   :  { %v2459_v54 = vsel %vm1615_vm4, 4294967295, %v2458_v54  ;;  %vm2461_vm9 = vmand %vm1568_vm10, %vm1557_vm8 }
  0x3d   :  { %vm2465_vm1 = vmmov %vm2464_vm13 }
  0x3e   :  { %1258 = vrot.lane.b32.xlu1 %v1217_v5, %s1443_s12  ;;  %1253 = vrot.lane.b32.xlu0 %v1212_v4, %s1443_s12 }
  0x42   :  { %1268 = vrot.lane.b32.xlu1 %v1217_v5, %s1444_s13  ;;  %1263 = vrot.lane.b32.xlu0 %v1212_v4, %s1444_s13 }
  0x46   :  { %1278 = vrot.lane.b32.xlu1 %v1217_v5, %s1445_s14  ;;  %1273 = vrot.lane.b32.xlu0 %v1212_v4, %s1445_s14 }
  0x9c   :  { %v1214_v46 = vpop.permute.xlu1 %1213  ;;  %v1204_v47 = vpop.permute.xlu0 %1203 }
  0x9d   :  { %v1216_v49 = vunpack.i.h.bf16 %v1214_v46  ;;  %v1215_v50 = vunpack.i.l.bf16 %v1214_v46  ;;  %v1206_v51 = vunpack.i.h.bf16 %v1204_v47  ;;  %v1205_v52 = vunpack.i.l.bf16 %v1204_v47 }
  0x9f   :  { %v130_v55 = vsel %vm2391_vm5, %v1215_v50, %v1216_v49  ;;  %v168_v56 = vsel %vm2460_vm11, %v1205_v52, %v1206_v51  ;;  %vm1639_vm5 = vcmp.eq.s32.totalorder %v48_v40, 15  ;;  %vm1649_vm11 = vcmp.eq.s32.totalorder %v46_v28, 15 }
  0xa0   :  { %v141_v57 = vsel %vm2461_vm9, %v130_v55, 0.0  ;;  %v179_v58 = vsel %vm1568_vm10, %v168_v56, 0.0  ;;  %v1219_v59 = vpop.permute.xlu1 %1218  ;;  %v1209_v60 = vpop.permute.xlu0 %1208  ;;  %v2463_v61 = vsel %vm1639_vm5, 4294967295, %v2462_v61  ;;  %v2467_v6 = vsel %vm1649_vm11, 4294967295, %v2466_v6  ;;  %vm2479_vm10 = vmmov %vm2478_vm3 }
  0xa1   :  { %v146_v62 = vsel %vm2464_vm13, %v141_v57, 0.0  ;;  %v183_v63 = vsel %vm2465_vm1, %v179_v58, 0.0  ;;  %v1221_v0 = vunpack.i.h.bf16 %v1219_v59  ;;  %v1220_v1 = vunpack.i.l.bf16 %v1219_v59  ;;  %vm2469_vm13 = vmmov %vm2468_vm6 }
  0xa2   :  { %v150_v2 = vpack.c.bf16 %v146_v62, %v146_v62  ;;  %v187_v3 = vpack.c.bf16 %v183_v63, %v183_v63  ;;  %v1211_v4 = vunpack.i.h.bf16 %v1209_v60  ;;  %v1210_v5 = vunpack.i.l.bf16 %v1209_v60  ;;  %vm2470_vm1 = vmmov %vm2468_vm6 }
  0xa3   :  { %v128_v7 = vsel %vm2468_vm6, %v1220_v1, %v1221_v0  ;;  %v129_v8 = vsel %vm2469_vm13, %v1216_v49, %v1220_v1  ;;  %v131_v9 = vsel %vm2470_vm1, %v1221_v0, %v1215_v50  ;;  %vm1659_vm9 = vcmp.eq.s32.totalorder %v45_v27, 15  ;;  %vm2475_vm6 = vmand %vm1576_vm12, %vm1550_vm7 }
  0xa4   :  { %v2472_v10 = vsel %vm1659_vm9, 4294967295, %v2471_v10  ;;  %154 = vst [vmem:[#allocation2 + $0x8] sm:$0xf] %v150_v2  ;;  %v195_v12 = vrot.slane %v187_v3, 4  ;;  %v140_v13 = vsel %vm2475_vm6, %v131_v9, 0.0  ;;  %vm2476_vm13 = vmand %vm1601_vm0, %vm1584_vm14  ;;  %v1229_v16 = vpop.permute.xlu1 %1228  ;;  %vm2481_vm6 = vcmp.lt.s32.totalorder %v1518_v21, 16  ;;  %v1224_v27 = vpop.permute.xlu0 %1223 }
  0xa5   :  { %v142_v14 = vsel %vm2476_vm13, %v129_v8, 0.0  ;;  %vm2477_vm1 = vmand %vm1608_vm15, %vm1615_vm4  ;;  %v145_v17 = vsel %vm2478_vm3, %v140_v13, 0.0  ;;  %v166_v22 = vsel %vm2481_vm6, %v1210_v5, %v1211_v4  ;;  %v1231_v33 = vunpack.i.h.bf16 %v1229_v16 }
  0xa6   :  { %v143_v15 = vsel %vm2477_vm1, %v128_v7, 0.0  ;;  %v147_v18 = vsel %vm2479_vm10, %v142_v14, 0.0  ;;  %vm2480_vm9 = vmmov %vm2478_vm3  ;;  %203 = vst [vmem:[#allocation2 + $0x8] sm:$0xf0] %v195_v12  ;;  %v149_v23 = vpack.c.bf16 %v145_v17, %v145_v17  ;;  %v181_v31 = vsel %vm1608_vm15, %v166_v22, 0.0 }
  0xa7   :  { %v148_v19 = vsel %vm2480_vm9, %v143_v15, 0.0  ;;  %v151_v24 = vpack.c.bf16 %v147_v18, %v147_v18  ;;  %vm2482_vm13 = vmmov %vm2481_vm6  ;;  %v1230_v49 = vunpack.i.l.bf16 %v1229_v16  ;;  %vm2485_vm9 = vmmov 1  }
  0xa8   :  { %v152_v25 = vpack.c.bf16 %v148_v19, %v148_v19  ;;  %v167_v26 = vsel %vm2482_vm13, %v1206_v51, %v1210_v5  ;;  %vm2483_vm1 = vmmov %vm2481_vm6  ;;  %153 = vst [vmem:[#allocation2] sm:$0xf] %v149_v23  ;;  %v2486_v50 = vmov 0  ;;  %v1707_v51 = vpop.permute.xlu1 %1238  ;;  %v1226_v57 = vunpack.i.h.bf16 %v1224_v27  ;;  %v1234_v9 = vpop.permute.xlu0 %1233 }
  0xa9   :  { %v169_v28 = vsel %vm2483_vm1, %v1211_v4, %v1205_v52  ;;  %v180_v30 = vsel %vm1601_vm0, %v167_v26, 0.0  ;;  %155 = vst [vmem:[#allocation2 + $0x10] sm:$0xf] %v151_v24  ;;  %vm2484_vm10 = vmmov %vm2478_vm3  ;;  %vm2489_vm1 = vcmp.lt.s32.totalorder %v1518_v21, 1  ;;  %v1225_v60 = vunpack.i.l.bf16 %v1224_v27 }
  0xaa   :  { %156 = vst [vmem:[#allocation2 + $0x18] sm:$0xf] %v152_v25  ;;  %v178_v40 = vsel %vm1576_vm12, %v169_v28, 0.0  ;;  %v184_v46 = vsel %vm2478_vm3, %v180_v30, 0.0  ;;  %v185_v47 = vsel %vm2484_vm10, %v181_v31, 0.0  ;;  %vm1703_vm6 = vmxor %vm1639_vm5, %vm2485_vm9  ;;  %v252_v59 = vsel %vm2489_vm1, %v1230_v49, %v1231_v33 }
  0xab   :  { %v2487_v50 = vsel %vm1703_vm6, 4294967295, %v2486_v50  ;;  %vm2488_vm13 = vmmov %vm2478_vm3  ;;  %v188_v55 = vpack.c.bf16 %v184_v46, %v184_v46  ;;  %v189_v56 = vpack.c.bf16 %v185_v47, %v185_v47  ;;  %v1241_v62 = vunpack.i.h.bf16 %v1707_v51 }
  0xac   :  { %v182_v52 = vsel %vm2488_vm13, %v178_v40, 0.0  ;;  %v267_v1 = vsel %vm1615_vm4, %v252_v59, 0.0  ;;  %vm2490_vm3 = vmmov %vm2489_vm1  ;;  %v2493_v8 = vmov 0  ;;  %v1734_v12 = vpop.permute.xlu1 %1248  ;;  %v2496_v17 = vmov 0  ;;  %v1244_v59 = vpop.permute.xlu0 %1243 }
  0xad   :  { %v186_v58 = vpack.c.bf16 %v182_v52, %v182_v52  ;;  %v196_v63 = vrot.slane %v188_v55, 4  ;;  %v197_v0 = vrot.slane %v189_v56, 4  ;;  %v253_v2 = vsel %vm2490_vm3, %v1226_v57, %v1230_v49  ;;  %vm2491_vm1 = vmmov %vm2484_vm10  ;;  %v485_v18 = vld [vmem:[#allocation2 + $0x8] sm:$0xff] }
  0xae   :  { %v271_v4 = vsel %vm2491_vm1, %v267_v1, 0.0  ;;  %v266_v5 = vsel %vm1584_vm14, %v253_v2, 0.0  ;;  %vm2492_vm7 = vmmov %vm2490_vm3  ;;  %v1240_v24 = vunpack.i.l.bf16 %v1707_v51  ;;  %508 = vmatprep.subr.bf16.mxu0 %v485_v18  ;;  %v1236_v30 = vunpack.i.h.bf16 %v1234_v9 }
  0xaf   :  { %v194_v3 = vrot.slane %v186_v58, 4  ;;  %v254_v7 = vsel %vm2492_vm7, %v1225_v60, %v1226_v57  ;;  %vm1730_vm3 = vmxor %vm1663_vm2, %vm2485_vm9  ;;  %204 = vst [vmem:[#allocation2 + $0x10] sm:$0xf0] %v196_v63  ;;  %v275_v13 = vpack.c.bf16 %v271_v4, %v271_v4  ;;  %v270_v14 = vsel %vm2491_vm1, %v266_v5, 0.0 }
  0xb0   :  { %v2494_v8 = vsel %vm1730_vm3, 4294967295, %v2493_v8  ;;  %205 = vst [vmem:[#allocation2 + $0x18] sm:$0xf0] %v197_v0  ;;  %vm2495_vm13 = vmmov %vm2492_vm7  ;;  %v265_v16 = vsel %vm1557_vm8, %v254_v7, 0.0  ;;  %v274_v19 = vpack.c.bf16 %v270_v14, %v270_v14  ;;  %vm2498_vm1 = vnez %v2441_v38 }
  0xb1   :  { %v255_v15 = vsel %vm2495_vm13, %v1231_v33, %v1225_v60  ;;  %vm1744_vm7 = vmxor %vm1649_vm11, %vm2485_vm9  ;;  %202 = vst [vmem:[#allocation2] sm:$0xf0] %v194_v3  ;;  %vm2500_vm13 = vnez %v2472_v10  ;;  %v283_v26 = vrot.slane %v275_v13, 4  ;;  %vm2504_vm8 = vcmp.lt.s32.totalorder %v1518_v21, 15  ;;  %v1795_v60 = vpop.permute.xlu1 %1258 }
  0xb2   :  { %v2497_v17 = vsel %vm1744_vm7, 4294967295, %v2496_v17  ;;  %v264_v22 = vsel %vm2498_vm1, %v255_v15, 0.0  ;;  %vm2499_vm2 = vmmov %vm2484_vm10  ;;  %v282_v31 = vrot.slane %v274_v19, 4  ;;  %v215_v40 = vsel %vm2504_vm8, %v1240_v24, %v1241_v62 }
  0xb3   :  { %v269_v23 = vsel %vm2499_vm2, %v265_v16, 0.0  ;;  %vm1756_vm5 = vmxor %vm2500_vm13, %vm2485_vm9  ;;  %v1235_v46 = vunpack.i.l.bf16 %v1234_v9  ;;  %291 = vst [vmem:[#allocation2 + $0x38] sm:$0xf0] %v283_v26  ;;  %v1251_v52 = vunpack.i.h.bf16 %v1734_v12  ;;  %vm2508_vm1 = vcmask 1043456  }
  0xb4   :  { %vm2503_vm10 = vmmov %vm2499_vm2  ;;  %v273_v28 = vpack.c.bf16 %v269_v23, %v269_v23  ;;  %290 = vst [vmem:[#allocation2 + $0x30] sm:$0xf0] %v282_v31  ;;  %v1250_v7 = vunpack.i.l.bf16 %v1734_v12  ;;  %v1246_v15 = vunpack.i.h.bf16 %v1244_v59  ;;  %v1245_v16 = vunpack.i.l.bf16 %v1244_v59 }
  0xb5   :  { %v268_v27 = vsel %vm2503_vm10, %v264_v22, 0.0  ;;  %vm2414_vm2 = vmand %vm1601_vm0, %vm1730_vm3  ;;  %vm2505_vm10 = vnez %v2447_v42  ;;  %v218_v1 = vsel %vm2504_vm8, %v1241_v62, %v1235_v46  ;;  %v1261_v23 = vunpack.i.h.bf16 %v1795_v60 }
  0xb6   :  { %v272_v33 = vpack.c.bf16 %v268_v27, %v268_v27  ;;  %vm2413_vm11 = vmand %vm2505_vm10, %vm1744_vm7  ;;  %v281_v47 = vrot.slane %v273_v28, 4  ;;  %v486_v62 = vld [vmem:[#allocation2 + $0x10] sm:$0xff]  ;;  %vm2544_vm0 = vcmp.lt.s32.totalorder %v1518_v21, 113 }
  0xb7   :  { %vm2506_vm13 = vmand %vm1608_vm15, %vm1703_vm6  ;;  %v487_v9 = vld [vmem:[#allocation2 + $0x18] sm:$0xff] }
  0xb8   :  { %v230_v49 = vsel %vm2506_vm13, %v215_v40, 0.0  ;;  %vm2507_vm4 = vmmov %vm2504_vm8  ;;  %v280_v55 = vrot.slane %v272_v33, 4  ;;  %289 = vst [vmem:[#allocation2 + $0x28] sm:$0xf0] %v281_v47  ;;  %v484_v18 = vld [vmem:[#allocation2] sm:$0xff]  ;;  %549 = vmatprep.subr.bf16.mxu1 %v487_v9  ;;  %v1254_v47 = vpop.permute.xlu0 %1253 }
  0xb9   :  { %v216_v51 = vsel %vm2507_vm4, %v1236_v30, %v1240_v24  ;;  %v234_v56 = vsel %vm2508_vm1, %v230_v49, 0.0  ;;  %vm2509_vm13 = vmmov %vm2507_vm4  ;;  %v1260_v24 = vunpack.i.l.bf16 %v1795_v60  ;;  %509 = vmatpush1.bf16.msra.mxu0 %v484_v18  ;;  %550 = vmatpush1.bf16.msra.mxu1 %v486_v62  ;;  %v1840_v49 = vpop.permute.xlu1 %1268 }
  0xba   :  { %v229_v57 = vsel %vm2414_vm2, %v216_v51, 0.0  ;;  %v217_v58 = vsel %vm2509_vm13, %v1235_v46, %v1236_v30  ;;  %v238_v63 = vpack.c.bf16 %v234_v56, %v234_v56  ;;  %vm2510_vm4 = vmmov %vm2508_vm1  ;;  %288 = vst [vmem:[#allocation2 + $0x20] sm:$0xf0] %v280_v55  ;;  %v2520_v46 = vmov 0 }
  0xbb   :  { %v233_v0 = vsel %vm2510_vm4, %v229_v57, 0.0  ;;  %v228_v2 = vsel %vm2413_vm11, %v217_v58, 0.0  ;;  %vm2511_vm1 = vmand %vm1576_vm12, %vm1756_vm5  ;;  %vm2518_vm11 = vcmask 1043456   ;;  %v2525_v57 = vmov 0 }
  0xbc   :  { %v237_v3 = vpack.c.bf16 %v233_v0, %v233_v0  ;;  %v227_v4 = vsel %vm2511_vm1, %v218_v1, 0.0  ;;  %vm2512_vm13 = vmmov %vm2510_vm4  ;;  %242 = vst [vmem:[#allocation2 + $0x38] sm:$0xf] %v238_v63 }
  0xbd   :  { %v232_v5 = vsel %vm2512_vm13, %v228_v2, 0.0  ;;  %vm2513_vm8 = vmmov %vm2510_vm4  ;;  %vm2514_vm4 = vcmp.lt.s32.totalorder %v1518_v21, 127 }
  0xbe   :  { %v231_v13 = vsel %vm2513_vm8, %v227_v4, 0.0  ;;  %v236_v14 = vpack.c.bf16 %v232_v5, %v232_v5  ;;  %241 = vst [vmem:[#allocation2 + $0x30] sm:$0xf] %v237_v3  ;;  %v313_v22 = vsel %vm2514_vm4, %v1250_v7, %v1251_v52  ;;  %vm2515_vm1 = vmmov %vm2514_vm4  ;;  %vm2524_vm4 = vcmp.eq.s32.totalorder %v1530_v32, 15 }
  0xbf   :  { %v235_v19 = vpack.c.bf16 %v231_v13, %v231_v13  ;;  %v327_v12 = vsel %vm1730_vm3, %v313_v22, 0.0  ;;  %v314_v26 = vsel %vm2515_vm1, %v1246_v15, %v1250_v7  ;;  %vm2516_vm13 = vmmov %vm2515_vm1  ;;  %v2532_v3 = vmov 0 }
  0xc0   :  { %240 = vst [vmem:[#allocation2 + $0x28] sm:$0xf] %v236_v14  ;;  %v315_v27 = vsel %vm2516_vm13, %v1245_v16, %v1246_v15  ;;  %vm2517_vm8 = vmmov %vm2515_vm1  ;;  %v331_v30 = vsel %vm2518_vm11, %v327_v12, 0.0  ;;  %v326_v31 = vsel %vm1744_vm7, %v314_v26, 0.0  ;;  %vm2519_vm1 = vcmp.eq.s32.totalorder %v1542_v36, 15 }
  0xc1   :  { %v316_v28 = vsel %vm2517_vm8, %v1251_v52, %v1245_v16  ;;  %239 = vst [vmem:[#allocation2 + $0x20] sm:$0xf] %v235_v19  ;;  %v325_v33 = vsel %vm1756_vm5, %v315_v27, 0.0  ;;  %vm1836_vm13 = vmxor %vm2519_vm1, %vm2485_vm9  ;;  %v335_v51 = vpack.c.bf16 %v331_v30, %v331_v30  ;;  %v330_v52 = vsel %vm2518_vm11, %v326_v31, 0.0  ;;  %v1264_v27 = vpop.permute.xlu0 %1263 }
  0xc2   :  { %v328_v40 = vsel %vm1703_vm6, %v316_v28, 0.0  ;;  %v2521_v46 = vsel %vm1836_vm13, 4294967295, %v2520_v46  ;;  %vm2522_vm8 = vmmov %vm2518_vm11  ;;  %v334_v58 = vpack.c.bf16 %v330_v52, %v330_v52  ;;  %vm2527_vm1 = vcmp.lt.s32.totalorder %v1518_v21, 112  ;;  %v1889_v28 = vpop.permute.xlu1 %1278 }
  0xc3   :  { %v329_v55 = vsel %vm2522_vm8, %v325_v33, 0.0  ;;  %vm2523_vm2 = vmmov %vm2522_vm8  ;;  %v399_v63 = vsel %vm2527_vm1, %v1260_v24, %v1261_v23  ;;  %vm2528_vm11 = vcmp.eq.s32.totalorder %v1527_v29, 15  ;;  %v343_v1 = vrot.slane %v335_v51, 4  ;;  %v491_v14 = vld [vmem:[#allocation2 + $0x38] sm:$0xff] }
  0xc4   :  { %v332_v56 = vsel %vm2523_vm2, %v328_v40, 0.0  ;;  %vm1848_vm10 = vmxor %vm2524_vm4, %vm2485_vm9  ;;  %v333_v59 = vpack.c.bf16 %v329_v55, %v329_v55  ;;  %v413_v2 = vsel %vm1836_vm13, %v399_v63, 0.0  ;;  %vm2531_vm2 = vcmp.eq.s32.totalorder %v1544_v37, 15  ;;  %551 = vmatprep.subr.bf16.mxu1 %v491_v14 }
  0xc5   :  { %v2526_v57 = vsel %vm1848_vm10, 4294967295, %v2525_v57  ;;  %v336_v60 = vpack.c.bf16 %v332_v56, %v332_v56  ;;  %vm1857_vm12 = vmxor %vm2528_vm11, %vm2485_vm9  ;;  %v1256_v4 = vunpack.i.h.bf16 %v1254_v47  ;;  %v1255_v5 = vunpack.i.l.bf16 %v1254_v47  ;;  %351 = vst [vmem:[#allocation2 + $0x50] sm:$0xf0] %v343_v1  ;;  %v490_v22 = vld [vmem:[#allocation2 + $0x30] sm:$0xff] }
  0xc6   :  { %vm1866_vm4 = vmxor %vm2531_vm2, %vm2485_vm9  ;;  %v342_v7 = vrot.slane %v334_v58, 4  ;;  %v341_v9 = vrot.slane %v333_v59, 4  ;;  %vm2535_vm11 = vcmp.lt.s32.totalorder %v1518_v21, 112  ;;  %552 = vmatpush1.bf16.msra.mxu1 %v490_v22  ;;  %v1270_v58 = vunpack.i.l.bf16 %v1840_v49 }
  0xc7   :  { %v2533_v3 = vsel %vm1866_vm4, 4294967295, %v2532_v3  ;;  %v344_v62 = vrot.slane %v336_v60, 4  ;;  %vm2534_vm1 = vmmov %vm2522_vm8  ;;  %v400_v16 = vsel %vm2535_vm11, %v1256_v4, %v1260_v24  ;;  %v489_v30 = vld [vmem:[#allocation2 + $0x28] sm:$0xff]  ;;  %vm2541_vm8 = vnez %v2441_v38 }
  0xc8   :  { %v417_v13 = vsel %vm2534_vm1, %v413_v2, 0.0  ;;  %vm2536_vm9 = vmmov %vm2535_vm11  ;;  %350 = vst [vmem:[#allocation2 + $0x48] sm:$0xf0] %v342_v7  ;;  %v412_v12 = vsel %vm1857_vm12, %v400_v16, 0.0  ;;  %510 = vmatprep.subr.bf16.mxu0 %v489_v30  ;;  %v488_v51 = vld [vmem:[#allocation2 + $0x20] sm:$0xff]  ;;  %v1266_v59 = vunpack.i.h.bf16 %v1264_v27  ;;  %v1265_v60 = vunpack.i.l.bf16 %v1264_v27 }
  0xc9   :  { %v421_v15 = vpack.c.bf16 %v417_v13, %v417_v13  ;;  %v401_v18 = vsel %vm2536_vm9, %v1255_v5, %v1256_v4  ;;  %vm2537_vm2 = vmmov %vm2536_vm9  ;;  %349 = vst [vmem:[#allocation2 + $0x40] sm:$0xf0] %v341_v9  ;;  %511 = vmatpush1.bf16.msra.mxu0 %v488_v51  ;;  %v1281_v63 = vunpack.i.h.bf16 %v1889_v28  ;;  %v1280_v1 = vunpack.i.l.bf16 %v1889_v28 }
  0xca   :  { %v402_v19 = vsel %vm2537_vm2, %v1261_v23, %v1255_v5  ;;  %352 = vst [vmem:[#allocation2 + $0x58] sm:$0xf0] %v344_v62  ;;  %v411_v26 = vsel %vm1848_vm10, %v401_v18, 0.0  ;;  %v1271_v23 = vunpack.i.h.bf16 %v1840_v49  ;;  %vm2538_vm11 = vmmov %vm2534_vm1  ;;  %vm2549_vm7 = vcmask 1043456  }
  0xcb   :  { %v414_v24 = vsel %vm1866_vm4, %v402_v19, 0.0  ;;  %v429_v31 = vrot.slane %v421_v15, 4  ;;  %v416_v33 = vsel %vm2538_vm11, %v412_v12, 0.0  ;;  %vm2539_vm9 = vmmov %vm2534_vm1  ;;  %v1274_v19 = vpop.permute.xlu0 %1273 }
  0xcc   :  { %v415_v40 = vsel %vm2539_vm9, %v411_v26, 0.0  ;;  %vm2540_vm2 = vmmov %vm2534_vm1  ;;  %v420_v52 = vpack.c.bf16 %v416_v33, %v416_v33  ;;  %vm2542_vm1 = vnez %v2443_v39  ;;  %vm2543_vm9 = vnez %v2459_v54  ;;  %v494_v22 = vld [vmem:[#allocation2 + $0x50] sm:$0xff] }
  0xcd   :  { %v418_v47 = vsel %vm2540_vm2, %v414_v24, 0.0  ;;  %v419_v55 = vpack.c.bf16 %v415_v40, %v415_v40  ;;  %437 = vst [vmem:[#allocation2 + $0x70] sm:$0xf0] %v429_v31  ;;  %v362_v5 = vsel %vm2544_vm0, %v1270_v58, %v1271_v23  ;;  %vm2545_vm11 = vmand %vm1836_vm13, %vm1584_vm14 }
  0xce   :  { %v422_v56 = vpack.c.bf16 %v418_v47, %v418_v47  ;;  %v428_v2 = vrot.slane %v420_v52, 4  ;;  %v376_v7 = vsel %vm2545_vm11, %v362_v5, 0.0  ;;  %vm2546_vm2 = vmmov %vm2544_vm0  ;;  %v1276_v52 = vunpack.i.h.bf16 %v1274_v19 }
  0xcf   :  { %v427_v49 = vrot.slane %v419_v55, 4  ;;  %v363_v9 = vsel %vm2546_vm2, %v1266_v59, %v1270_v58  ;;  %vm2547_vm15 = vmmov %vm2544_vm0  ;;  %v380_v14 = vsel %vm2549_vm7, %v376_v7, 0.0  ;;  %v493_v27 = vld [vmem:[#allocation2 + $0x48] sm:$0xff]  ;;  %v1275_v55 = vunpack.i.l.bf16 %v1274_v19 }
  0xd0   :  { %v430_v4 = vrot.slane %v422_v56, 4  ;;  %v364_v62 = vsel %vm2547_vm15, %v1265_v60, %v1266_v59  ;;  %vm2548_vm6 = vmmov %vm2544_vm0  ;;  %436 = vst [vmem:[#allocation2 + $0x68] sm:$0xf0] %v428_v2  ;;  %v384_v12 = vpack.c.bf16 %v380_v14, %v380_v14  ;;  %v492_v30 = vld [vmem:[#allocation2 + $0x40] sm:$0xff]  ;;  %512 = vmatprep.subr.bf16.mxu0 %v493_v27 }
  0xd1   :  { %v365_v13 = vsel %vm2548_vm6, %v1271_v23, %v1265_v60  ;;  %435 = vst [vmem:[#allocation2 + $0x60] sm:$0xf0] %v427_v49  ;;  %vm2550_vm11 = vmand %vm1857_vm12, %vm2542_vm1  ;;  %v495_v28 = vld [vmem:[#allocation2 + $0x58] sm:$0xff]  ;;  %513 = vmatpush1.bf16.msra.mxu0 %v492_v30 }
  0xd2   :  { %438 = vst [vmem:[#allocation2 + $0x78] sm:$0xf0] %v430_v4  ;;  %v375_v15 = vsel %vm2550_vm11, %v363_v9, 0.0  ;;  %vm2551_vm15 = vmand %vm1848_vm10, %vm2541_vm8  ;;  %553 = vmatprep.subr.bf16.mxu1 %v495_v28 }
  0xd3   :  { %v374_v16 = vsel %vm2551_vm15, %v364_v62, 0.0  ;;  %vm2552_vm6 = vmand %vm1866_vm4, %vm2543_vm9  ;;  %vm2556_vm15 = vcmp.lt.s32.totalorder %v1518_v21, 111  ;;  %388 = vst [vmem:[#allocation2 + $0x70] sm:$0xf] %v384_v12  ;;  %554 = vmatpush1.bf16.msra.mxu1 %v494_v22 }
  0xd4   :  { %v377_v18 = vsel %vm2552_vm6, %v365_v13, 0.0  ;;  %vm2553_vm2 = vmmov %vm2549_vm7  ;;  %v448_v47 = vsel %vm2556_vm15, %v1280_v1, %v1281_v63  ;;  %vm2557_vm6 = vnez %v2497_v17 }
  0xd5   :  { %v379_v26 = vsel %vm2553_vm2, %v375_v15, 0.0  ;;  %vm2554_vm11 = vmmov %vm2553_vm2 }
  0xd6   :  { %v378_v24 = vsel %vm2554_vm11, %v374_v16, 0.0  ;;  %vm2555_vm0 = vmmov %vm2553_vm2  ;;  %v383_v31 = vpack.c.bf16 %v379_v26, %v379_v26  ;;  %vm2559_vm2 = vnez %v2487_v50 }
  0xd7   :  { %v381_v23 = vsel %vm2555_vm0, %v377_v18, 0.0  ;;  %v382_v33 = vpack.c.bf16 %v378_v24, %v378_v24  ;;  %vm2558_vm0 = vmand %vm1836_vm13, %vm1730_vm3  ;;  %v483_v24 = vld [vmem:[#allocation7] sm:$0xf] }
  0xd8   :  { %v385_v40 = vpack.c.bf16 %v381_v23, %v381_v23  ;;  %v462_v51 = vsel %vm2558_vm0, %v448_v47, 0.0  ;;  %387 = vst [vmem:[#allocation2 + $0x68] sm:$0xf] %v383_v31  ;;  %vm2560_vm15 = vmmov %vm2549_vm7  ;;  %vm2561_vm7 = vcmp.lt.s32.totalorder %v1518_v21, 111 }
  0xd9   :  { %386 = vst [vmem:[#allocation2 + $0x60] sm:$0xf] %v382_v33  ;;  %v466_v56 = vsel %vm2560_vm15, %v462_v51, 0.0  ;;  %v449_v59 = vsel %vm2561_vm7, %v1276_v52, %v1280_v1  ;;  %vm2562_vm0 = vmmov %vm2561_vm7 }
  0xda   :  { %389 = vst [vmem:[#allocation2 + $0x78] sm:$0xf] %v385_v40  ;;  %v470_v58 = vpack.c.bf16 %v466_v56, %v466_v56  ;;  %v450_v60 = vsel %vm2562_vm0, %v1275_v55, %v1276_v52  ;;  %vm2563_vm13 = vmmov %vm2562_vm0  ;;  %v498_v14 = vld [vmem:[#allocation2 + $0x70] sm:$0xff] }
  0xdb   :  { %v451_v2 = vsel %vm2563_vm13, %v1281_v63, %v1275_v55  ;;  %vm2564_vm11 = vmand %vm1857_vm12, %vm2557_vm6  ;;  %vm2567_vm13 = vcmask 1043456  }
  0xdc   :  { %v461_v49 = vsel %vm2564_vm11, %v449_v59, 0.0  ;;  %vm2565_vm15 = vmand %vm1848_vm10, %vm1756_vm5  ;;  %474 = vst [vmem:[#allocation2 + $0x90] sm:$0xf] %v470_v58  ;;  %vm2570_vm11 = vcmp.lt.s32.totalorder %v1518_v21, 16 }
  0xdd   :  { %v460_v4 = vsel %vm2565_vm15, %v450_v60, 0.0  ;;  %vm2566_vm7 = vmand %vm1866_vm4, %vm2559_vm2  ;;  %v465_v63 = vsel %vm2567_vm13, %v461_v49, 0.0  ;;  %vm2576_vm4 = vnez %v2449_v43 }
  0xde   :  { %v463_v1 = vsel %vm2566_vm7, %v451_v2, 0.0  ;;  %vm2568_vm0 = vmmov %vm2567_vm13  ;;  %v469_v9 = vpack.c.bf16 %v465_v63, %v465_v63 }
  0xdf   :  { %v464_v5 = vsel %vm2568_vm0, %v460_v4, 0.0  ;;  %vm2569_vm3 = vmmov %vm2568_vm0  ;;  %v497_v15 = vld [vmem:[#allocation2 + $0x68] sm:$0xff]  ;;  %vm2574_vm0 = vnez %v2457_v53 }
  0xe0   :  { %v467_v7 = vsel %vm2569_vm3, %v463_v1, 0.0  ;;  %v468_v62 = vpack.c.bf16 %v464_v5, %v464_v5  ;;  %473 = vst [vmem:[#allocation2 + $0x88] sm:$0xf] %v469_v9  ;;  %v496_v18 = vld [vmem:[#allocation2 + $0x60] sm:$0xff]  ;;  %514 = vmatprep.subr.bf16.mxu0 %v497_v15  ;;  %vm2430_vm3 = vcmask 654336   ;;  %vm2571_vm15 = vmmov %vm2570_vm11 }
  0xe1   :  { %v471_v13 = vpack.c.bf16 %v467_v7, %v467_v7  ;;  %v499_v16 = vld [vmem:[#allocation2 + $0x78] sm:$0xff]  ;;  %515 = vmatpush1.bf16.msra.mxu0 %v496_v18  ;;  %vm2572_vm7 = vmmov %vm2570_vm11 }
  0xe2   :  { %472 = vst [vmem:[#allocation2 + $0x80] sm:$0xf] %v468_v62  ;;  %555 = vmatprep.subr.bf16.mxu1 %v499_v16  ;;  %vm2573_vm13 = vmmov %vm2572_vm7 }
  0xe3   :  { %475 = vst [vmem:[#allocation2 + $0x98] sm:$0xf] %v471_v13  ;;  %556 = vmatpush1.bf16.msra.mxu1 %v498_v14  ;;  %v502_v19 = vld [vmem:[#allocation2 + $0x90] sm:$0xff] }
  0xe7   :  { %v501_v22 = vld [vmem:[#allocation2 + $0x88] sm:$0xff] }
  0xe8   :  { %516 = vmatprep.subr.bf16.mxu0 %v501_v22 }
  0xe9   :  { %v500_v26 = vld [vmem:[#allocation2 + $0x80] sm:$0xff] }
  0xea   :  { %v503_v12 = vld [vmem:[#allocation2 + $0x98] sm:$0xff]  ;;  %517 = vmatpush1.bf16.msra.mxu0 %v500_v26 }
  0xeb   :  { %557 = vmatprep.subr.bf16.mxu1 %v503_v12 }
  0xec   :  { %558 = vmatpush1.bf16.msra.mxu1 %v502_v19 }
  0xed   :  { %1182 = vmatmul.mubr.msk.bf16.vlgmr.msra.gmra.mrb[0].mxu0 %vm2430_vm3, %v483_v24 }
  0xee   :  { %902 = vmatprep.mubr.bf16.mxu0 %v1447_v20 }
  0xef   :  { %1183 = vmatmul.mubr.msk.bf16.vlgmr.msra.gmra.mrb[0].mxu1 %vm2430_vm3, %v483_v24  ;;  %vm2575_vm3 = vnez %v2455_v48 }
  0xf0   :  { %943 = vmatprep.mubr.bf16.mxu1 %v1447_v20 }
 0x1c0   :  { %v542_v23 = vpop.f32.mrb[0].mxu0 }
 0x1c1   :  { %v590_v28 = vmax.f32 %v542_v23, 0.0  ;;  %v544_v31 = vpop.f32.mrb[1].mxu0 }
 0x1c2   :  { %v583_v27 = vpop.f32.mrb[0].mxu1  ;;  %v591_v40 = vmax.f32 %v544_v31, 0.0  ;;  %v546_v51 = vpop.f32.mrb[2].mxu0 }
 0x1c3   :  { %v592_v30 = vmax.f32 %v583_v27, 0.0  ;;  %v585_v33 = vpop.f32.mrb[1].mxu1  ;;  %v547_v55 = vpop.f32.mrb[3].mxu0  ;;  %v714_v58 = vpack.c.bf16 %v590_v28, %v590_v28 }
 0x1c4   :  { %v593_v47 = vmax.f32 %v585_v33, 0.0  ;;  %v587_v52 = vpop.f32.mrb[2].mxu1  ;;  %v1282_v2 = vpack.i.bf16 %v591_v40, %v590_v28  ;;  %v715_v20 = vpack.c.bf16 %v591_v40, %v591_v40 }
 0x1c5   :  { %v588_v56 = vpop.f32.mrb[3].mxu1  ;;  %v716_v59 = vpack.c.bf16 %v592_v30, %v592_v30  ;;  %718 = vst [vmem:[#allocation3 + $0x40] sm:$0xf] %v714_v58 }
 0x1c6   :  { %v1287_v60 = vpack.i.bf16 %v593_v47, %v592_v30  ;;  %1283 = vrot.lane.b32.xlu0 %v1282_v2, %s1439_s9  ;;  %v717_v49 = vpack.c.bf16 %v593_v47, %v593_v47  ;;  %719 = vst [vmem:[#allocation3 + $0x48] sm:$0xf] %v715_v20 }
 0x1c7   :  { %720 = vst [vmem:[#allocation3 + $0x50] sm:$0xf] %v716_v59 }
 0x1c8   :  { %1288 = vrot.lane.b32.xlu1 %v1287_v60, %s1439_s9  ;;  %721 = vst [vmem:[#allocation3 + $0x58] sm:$0xf] %v717_v49 }
 0x1ca   :  { %1293 = vrot.lane.b32.xlu0 %v1282_v2, %s1438_s8 }
 0x1cc   :  { %1298 = vrot.lane.b32.xlu1 %v1287_v60, %s1438_s8 }
 0x1ce   :  { %1303 = vrot.lane.b32.xlu0 %v1282_v2, %s1440_s1 }
 0x1d0   :  { %1308 = vrot.lane.b32.xlu1 %v1287_v60, %s1440_s1 }
 0x1d2   :  { %1313 = vrot.lane.b32.xlu0 %v1282_v2, %s1441_s10 }
 0x1d4   :  { %1318 = vrot.lane.b32.xlu1 %v1287_v60, %s1441_s10 }
 0x1d6   :  { %1323 = vrot.lane.b32.xlu0 %v1282_v2, %s1442_s11 }
 0x1d8   :  { %1328 = vrot.lane.b32.xlu1 %v1287_v60, %s1442_s11 }
 0x1da   :  { %1333 = vrot.lane.b32.xlu0 %v1282_v2, %s1443_s12 }
 0x1dc   :  { %1338 = vrot.lane.b32.xlu1 %v1287_v60, %s1443_s12 }
 0x1de   :  { %1343 = vrot.lane.b32.xlu0 %v1282_v2, %s1444_s13 }
 0x1e0   :  { %1348 = vrot.lane.b32.xlu1 %v1287_v60, %s1444_s13 }
 0x1e2   :  { %1353 = vrot.lane.b32.xlu0 %v1282_v2, %s1445_s14 }
 0x1e4   :  { %1358 = vrot.lane.b32.xlu1 %v1287_v60, %s1445_s14 }
 0x238   :  { %v1284_v1 = vpop.permute.xlu0 %1283 }
 0x239   :  { %v1286_v7 = vunpack.i.h.bf16 %v1284_v1  ;;  %v1285_v9 = vunpack.i.l.bf16 %v1284_v1 }
 0x23a   :  { %v1289_v4 = vpop.permute.xlu1 %1288 }
 0x23b   :  { %v1291_v63 = vunpack.i.h.bf16 %v1289_v4  ;;  %v1290_v5 = vunpack.i.l.bf16 %v1289_v4  ;;  %v628_v14 = vsel %vm2572_vm7, %v1285_v9, %v1286_v7 }
 0x23c   :  { %v1294_v26 = vpop.permute.xlu0 %1293 }
 0x23d   :  { %v626_v62 = vsel %vm2570_vm11, %v1290_v5, %v1291_v63  ;;  %v627_v13 = vsel %vm2571_vm15, %v1286_v7, %v1290_v5  ;;  %v629_v15 = vsel %vm2573_vm13, %v1291_v63, %v1285_v9  ;;  %vm2577_vm11 = vnez %v2447_v42 }
 0x23e   :  { %v633_v16 = vsel %vm2574_vm0, %v626_v62, 0.0  ;;  %v632_v18 = vsel %vm2575_vm3, %v627_v13, 0.0  ;;  %v630_v19 = vsel %vm2576_vm4, %v629_v15, 0.0  ;;  %v631_v22 = vsel %vm2577_vm11, %v628_v14, 0.0  ;;  %v1299_v12 = vpop.permute.xlu1 %1298 }
 0x23f   :  { %v637_v24 = vpack.c.bf16 %v633_v16, %v633_v16  ;;  %v636_v23 = vpack.c.bf16 %v632_v18, %v632_v18  ;;  %v634_v27 = vpack.c.bf16 %v630_v19, %v630_v19  ;;  %v635_v28 = vpack.c.bf16 %v631_v22, %v631_v22 }
 0x240   :  { %v1301_v30 = vunpack.i.h.bf16 %v1299_v12  ;;  %v1300_v31 = vunpack.i.l.bf16 %v1299_v12  ;;  %v1296_v33 = vunpack.i.h.bf16 %v1294_v26  ;;  %v1295_v40 = vunpack.i.l.bf16 %v1294_v26  ;;  %v1304_v20 = vpop.permute.xlu0 %1303 }
 0x241   :  { %v645_v47 = vrot.slane %v637_v24, 4  ;;  %v644_v51 = vrot.slane %v636_v23, 4  ;;  %v642_v52 = vrot.slane %v634_v27, 4  ;;  %v643_v55 = vrot.slane %v635_v28, 4 }
 0x242   :  { %vm2578_vm15 = vcmp.lt.s32.totalorder %v1518_v21, 17  ;;  %v1309_v2 = vpop.permute.xlu1 %1308  ;;  %v1306_v15 = vunpack.i.h.bf16 %v1304_v20  ;;  %v1305_v16 = vunpack.i.l.bf16 %v1304_v20 }
 0x243   :  { %v602_v56 = vsel %vm2578_vm15, %v1300_v31, %v1301_v30  ;;  %vm2579_vm7 = vmmov %vm2578_vm15  ;;  %653 = vst [vmem:[#allocation3 + $0x18] sm:$0xf0] %v645_v47  ;;  %v1311_v13 = vunpack.i.h.bf16 %v1309_v2  ;;  %v1310_v14 = vunpack.i.l.bf16 %v1309_v2 }
 0x244   :  { %v603_v58 = vsel %vm2579_vm7, %v1296_v33, %v1300_v31  ;;  %vm2580_vm13 = vmmov %vm2579_vm7  ;;  %652 = vst [vmem:[#allocation3 + $0x10] sm:$0xf0] %v644_v51  ;;  %v1314_v19 = vpop.permute.xlu0 %1313 }
 0x245   :  { %v604_v59 = vsel %vm2580_vm13, %v1295_v40, %v1296_v33  ;;  %vm2581_vm10 = vmmov %vm2579_vm7  ;;  %650 = vst [vmem:[#allocation3] sm:$0xf0] %v642_v52 }
 0x246   :  { %v605_v60 = vsel %vm2581_vm10, %v1301_v30, %v1295_v40  ;;  %651 = vst [vmem:[#allocation3 + $0x8] sm:$0xf0] %v643_v55  ;;  %vm2582_vm15 = vmand %vm2574_vm0, %vm2543_vm9  ;;  %v1319_v18 = vpop.permute.xlu1 %1318  ;;  %v1316_v55 = vunpack.i.h.bf16 %v1314_v19 }
 0x247   :  { %v609_v49 = vsel %vm2582_vm15, %v602_v56, 0.0  ;;  %vm2583_vm7 = vmand %vm2575_vm3, %vm1584_vm14  ;;  %vm2586_vm15 = vcmp.lt.s32.totalorder %v1518_v21, 1  ;;  %v1321_v51 = vunpack.i.h.bf16 %v1319_v18  ;;  %v1320_v52 = vunpack.i.l.bf16 %v1319_v18 }
 0x248   :  { %v608_v4 = vsel %vm2583_vm7, %v603_v58, 0.0  ;;  %vm2584_vm10 = vmand %vm2576_vm4, %vm2541_vm8  ;;  %v613_v5 = vpack.c.bf16 %v609_v49, %v609_v49  ;;  %v686_v22 = vsel %vm2586_vm15, %v1310_v14, %v1311_v13  ;;  %v1315_v56 = vunpack.i.l.bf16 %v1314_v19 }
 0x249   :  { %v606_v1 = vsel %vm2584_vm10, %v605_v60, 0.0  ;;  %vm2585_vm13 = vmand %vm2577_vm11, %vm2542_vm1  ;;  %v612_v7 = vpack.c.bf16 %v608_v4, %v608_v4  ;;  %v693_v23 = vsel %vm2543_vm9, %v686_v22, 0.0 }
 0x24a   :  { %v607_v63 = vsel %vm2585_vm13, %v604_v59, 0.0  ;;  %v610_v9 = vpack.c.bf16 %v606_v1, %v606_v1  ;;  %617 = vst [vmem:[#allocation3 + $0x18] sm:$0xf] %v613_v5  ;;  %vm2587_vm7 = vmmov %vm2586_vm15  ;;  %v697_v31 = vpack.c.bf16 %v693_v23, %v693_v23  ;;  %v1329_v58 = vpop.permute.xlu1 %1328  ;;  %v1324_v59 = vpop.permute.xlu0 %1323  ;;  %vm2590_vm15 = vcmp.lt.s32.totalorder %v1518_v21, 15 }
 0x24b   :  { %v611_v62 = vpack.c.bf16 %v607_v63, %v607_v63  ;;  %616 = vst [vmem:[#allocation3 + $0x10] sm:$0xf] %v612_v7  ;;  %v687_v12 = vsel %vm2587_vm7, %v1306_v15, %v1310_v14  ;;  %vm2588_vm10 = vmmov %vm2587_vm7  ;;  %v662_v4 = vsel %vm2590_vm15, %v1320_v52, %v1321_v51  ;;  %v1326_v23 = vunpack.i.h.bf16 %v1324_v59 }
 0x24c   :  { %614 = vst [vmem:[#allocation3] sm:$0xf] %v610_v9  ;;  %v688_v26 = vsel %vm2588_vm10, %v1305_v16, %v1306_v15  ;;  %vm2589_vm13 = vmmov %vm2587_vm7  ;;  %v692_v27 = vsel %vm1584_vm14, %v687_v12, 0.0  ;;  %v705_v60 = vrot.slane %v697_v31, 4 }
 0x24d   :  { %615 = vst [vmem:[#allocation3 + $0x8] sm:$0xf] %v611_v62  ;;  %v689_v24 = vsel %vm2589_vm13, %v1311_v13, %v1305_v16  ;;  %v691_v30 = vsel %vm2542_vm1, %v688_v26, 0.0  ;;  %v696_v33 = vpack.c.bf16 %v692_v27, %v692_v27  ;;  %vm2591_vm7 = vmmov %vm2590_vm15  ;;  %vm2595_vm15 = vnez %v2494_v8 }
 0x24e   :  { %v690_v28 = vsel %vm2541_vm8, %v689_v24, 0.0  ;;  %v695_v47 = vpack.c.bf16 %v691_v30, %v691_v30  ;;  %v663_v1 = vsel %vm2591_vm7, %v1316_v55, %v1320_v52  ;;  %vm2592_vm10 = vmmov %vm2591_vm7  ;;  %713 = vst [vmem:[#allocation3 + $0x38] sm:$0xf0] %v705_v60  ;;  %v1339_v19 = vpop.permute.xlu1 %1338  ;;  %v1334_v22 = vpop.permute.xlu0 %1333  ;;  %v1331_v26 = vunpack.i.h.bf16 %v1329_v58 }
 0x24f   :  { %v694_v40 = vpack.c.bf16 %v690_v28, %v690_v28  ;;  %v704_v2 = vrot.slane %v696_v33, 4  ;;  %v664_v63 = vsel %vm2592_vm10, %v1315_v56, %v1316_v55  ;;  %vm2593_vm13 = vmmov %vm2591_vm7  ;;  %v1330_v24 = vunpack.i.l.bf16 %v1329_v58 }
 0x250   :  { %v703_v49 = vrot.slane %v695_v47, 4  ;;  %v665_v5 = vsel %vm2593_vm13, %v1321_v51, %v1315_v56  ;;  %vm2594_vm9 = vmand %vm2574_vm0, %vm2559_vm2  ;;  %v1325_v27 = vunpack.i.l.bf16 %v1324_v59  ;;  %v1341_v42 = vunpack.i.h.bf16 %v1339_v19 }
 0x251   :  { %v702_v20 = vrot.slane %v694_v40, 4  ;;  %712 = vst [vmem:[#allocation3 + $0x30] sm:$0xf0] %v704_v2  ;;  %v669_v7 = vsel %vm2594_vm9, %v662_v4, 0.0  ;;  %vm2596_vm7 = vmand %vm2575_vm3, %vm2595_vm15  ;;  %v850_v14 = vld [vmem:[#allocation3 + $0x18] sm:$0xff]  ;;  %v1340_v28 = vunpack.i.l.bf16 %v1339_v19  ;;  %v1336_v30 = vunpack.i.h.bf16 %v1334_v22 }
 0x252   :  { %711 = vst [vmem:[#allocation3 + $0x28] sm:$0xf0] %v703_v49  ;;  %v668_v9 = vsel %vm2596_vm7, %v663_v1, 0.0  ;;  %vm2597_vm10 = vmand %vm2576_vm4, %vm1756_vm5  ;;  %v673_v15 = vpack.c.bf16 %v669_v7, %v669_v7  ;;  %v849_v12 = vld [vmem:[#allocation3 + $0x10] sm:$0xff]  ;;  %911 = vmatprep.subr.bf16.mxu1 %v850_v14  ;;  %v1335_v31 = vunpack.i.l.bf16 %v1334_v22  ;;  %vm2599_vm4 = vcmp.lt.s32.totalorder %v1518_v21, 127  ;;  %v1344_v7 = vpop.permute.xlu0 %1343 }
 0x253   :  { %710 = vst [vmem:[#allocation3 + $0x20] sm:$0xf0] %v702_v20  ;;  %v666_v62 = vsel %vm2597_vm10, %v665_v5, 0.0  ;;  %vm2598_vm13 = vmand %vm2577_vm11, %vm2557_vm6  ;;  %v672_v48 = vpack.c.bf16 %v668_v9, %v668_v9  ;;  %v847_v43 = vld [vmem:[#allocation3] sm:$0xff]  ;;  %912 = vmatpush1.bf16.msra.mxu1 %v849_v12  ;;  %v730_v33 = vsel %vm2599_vm4, %v1330_v24, %v1331_v26  ;;  %vm2603_vm11 = vcmp.lt.s32.totalorder %v1518_v21, 112  ;;  %v1349_v5 = vpop.permute.xlu1 %1348 }
 0x254   :  { %v667_v53 = vsel %vm2598_vm13, %v664_v63, 0.0  ;;  %v848_v13 = vld [vmem:[#allocation3 + $0x8] sm:$0xff]  ;;  %v670_v16 = vpack.c.bf16 %v666_v62, %v666_v62  ;;  %677 = vst [vmem:[#allocation3 + $0x38] sm:$0xf] %v673_v15  ;;  %vm2600_vm9 = vmmov %vm2599_vm4  ;;  %v736_v52 = vsel %vm2595_vm15, %v730_v33, 0.0  ;;  %v790_v49 = vsel %vm2603_vm11, %v1340_v28, %v1341_v42 }
 0x255   :  { %v671_v18 = vpack.c.bf16 %v667_v53, %v667_v53  ;;  %870 = vmatprep.subr.bf16.mxu0 %v848_v13  ;;  %676 = vst [vmem:[#allocation3 + $0x30] sm:$0xf] %v672_v48  ;;  %v731_v40 = vsel %vm2600_vm9, %v1326_v23, %v1330_v24  ;;  %vm2601_vm3 = vmmov %vm2599_vm4  ;;  %v740_v59 = vpack.c.bf16 %v736_v52, %v736_v52 }
 0x256   :  { %871 = vmatpush1.bf16.msra.mxu0 %v847_v43  ;;  %674 = vst [vmem:[#allocation3 + $0x20] sm:$0xf] %v670_v16  ;;  %v732_v47 = vsel %vm2601_vm3, %v1325_v27, %v1326_v23  ;;  %vm2602_vm0 = vmmov %vm2601_vm3  ;;  %v735_v55 = vsel %vm2557_vm6, %v731_v40, 0.0  ;;  %vm2607_vm4 = vnez %v2521_v46  ;;  %vm2608_vm9 = vnez %v2526_v57 }
 0x257   :  { %675 = vst [vmem:[#allocation3 + $0x28] sm:$0xf] %v671_v18  ;;  %v733_v51 = vsel %vm2602_vm0, %v1331_v26, %v1325_v27  ;;  %v734_v56 = vsel %vm1756_vm5, %v732_v47, 0.0  ;;  %v739_v60 = vpack.c.bf16 %v735_v55, %v735_v55  ;;  %vm2604_vm7 = vmmov %vm2603_vm11  ;;  %v748_v9 = vrot.slane %v740_v59, 4  ;;  %v1354_v59 = vpop.permute.xlu0 %1353 }
 0x258   :  { %v737_v58 = vsel %vm2559_vm2, %v733_v51, 0.0  ;;  %v738_v2 = vpack.c.bf16 %v734_v56, %v734_v56  ;;  %v791_v4 = vsel %vm2604_vm7, %v1336_v30, %v1340_v28  ;;  %vm2605_vm10 = vmmov %vm2604_vm7  ;;  %v796_v14 = vsel %vm2607_vm4, %v790_v49, 0.0 }
 0x259   :  { %v741_v20 = vpack.c.bf16 %v737_v58, %v737_v58  ;;  %v792_v1 = vsel %vm2605_vm10, %v1335_v31, %v1336_v30  ;;  %vm2606_vm13 = vmmov %vm2604_vm7  ;;  %v747_v62 = vrot.slane %v739_v60, 4  ;;  %v795_v15 = vsel %vm1857_vm12, %v791_v4, 0.0  ;;  %756 = vst [vmem:[#allocation3 + $0x50] sm:$0xf0] %v748_v9  ;;  %v1359_v58 = vpop.permute.xlu1 %1358 }
 0x25a   :  { %v793_v63 = vsel %vm2606_vm13, %v1341_v42, %v1335_v31  ;;  %v746_v53 = vrot.slane %v738_v2, 4  ;;  %v794_v48 = vsel %vm2608_vm9, %v792_v1, 0.0  ;;  %vm2609_vm3 = vnez %v2533_v3  ;;  %vm2614_vm13 = vmand %vm2607_vm4, %vm1584_vm14 }
 0x25b   :  { %v749_v13 = vrot.slane %v741_v20, 4  ;;  %v797_v16 = vsel %vm2609_vm3, %v793_v63, 0.0  ;;  %755 = vst [vmem:[#allocation3 + $0x48] sm:$0xf0] %v747_v62  ;;  %v800_v18 = vpack.c.bf16 %v796_v14, %v796_v14  ;;  %v799_v19 = vpack.c.bf16 %v795_v15, %v795_v15  ;;  %v854_v26 = vld [vmem:[#allocation3 + $0x38] sm:$0xff] }
 0x25c   :  { %754 = vst [vmem:[#allocation3 + $0x40] sm:$0xf0] %v746_v53  ;;  %v798_v22 = vpack.c.bf16 %v794_v48, %v794_v48  ;;  %v801_v43 = vpack.c.bf16 %v797_v16, %v797_v16  ;;  %v1351_v23 = vunpack.i.h.bf16 %v1349_v5  ;;  %v1350_v27 = vunpack.i.l.bf16 %v1349_v5  ;;  %913 = vmatprep.subr.bf16.mxu1 %v854_v26  ;;  %v853_v30 = vld [vmem:[#allocation3 + $0x30] sm:$0xff] }
 0x25d   :  { %757 = vst [vmem:[#allocation3 + $0x58] sm:$0xf0] %v749_v13  ;;  %v851_v24 = vld [vmem:[#allocation3 + $0x20] sm:$0xff]  ;;  %v1346_v42 = vunpack.i.h.bf16 %v1344_v7  ;;  %v1345_v28 = vunpack.i.l.bf16 %v1344_v7  ;;  %v808_v31 = vrot.slane %v800_v18, 4  ;;  %v807_v33 = vrot.slane %v799_v19, 4  ;;  %914 = vmatpush1.bf16.msra.mxu1 %v853_v30 }
 0x25e   :  { %v852_v12 = vld [vmem:[#allocation3 + $0x28] sm:$0xff]  ;;  %v806_v40 = vrot.slane %v798_v22, 4  ;;  %v809_v47 = vrot.slane %v801_v43, 4  ;;  %vm2610_vm0 = vcmp.lt.s32.totalorder %v1518_v21, 113  ;;  %v1361_v5 = vunpack.i.h.bf16 %v1359_v58 }
 0x25f   :  { %872 = vmatprep.subr.bf16.mxu0 %v852_v12  ;;  %v766_v51 = vsel %vm2610_vm0, %v1350_v27, %v1351_v23  ;;  %vm2611_vm11 = vmmov %vm2610_vm0  ;;  %816 = vst [vmem:[#allocation3 + $0x70] sm:$0xf0] %v808_v31  ;;  %v1360_v39 = vunpack.i.l.bf16 %v1359_v58  ;;  %v1356_v7 = vunpack.i.h.bf16 %v1354_v59  ;;  %v1355_v9 = vunpack.i.l.bf16 %v1354_v59 }
 0x260   :  { %873 = vmatpush1.bf16.msra.mxu0 %v851_v24  ;;  %v767_v52 = vsel %vm2611_vm11, %v1346_v42, %v1350_v27  ;;  %vm2612_vm7 = vmmov %vm2610_vm0  ;;  %815 = vst [vmem:[#allocation3 + $0x68] sm:$0xf0] %v807_v33  ;;  %v772_v60 = vsel %vm2614_vm13, %v766_v51, 0.0  ;;  %vm2619_vm14 = vcmp.lt.s32.totalorder %v1518_v21, 111  ;;  %v857_v48 = vld [vmem:[#allocation3 + $0x50] sm:$0xff] }
 0x261   :  { %v768_v55 = vsel %vm2612_vm7, %v1345_v28, %v1346_v42  ;;  %vm2613_vm10 = vmmov %vm2610_vm0  ;;  %814 = vst [vmem:[#allocation3 + $0x60] sm:$0xf0] %v806_v40  ;;  %vm2617_vm7 = vnez %v2459_v54  ;;  %v776_v49 = vpack.c.bf16 %v772_v60, %v772_v60  ;;  %v826_v54 = vsel %vm2619_vm14, %v1360_v39, %v1361_v5 }
 0x262   :  { %v769_v56 = vsel %vm2613_vm10, %v1351_v23, %v1345_v28  ;;  %817 = vst [vmem:[#allocation3 + $0x78] sm:$0xf0] %v809_v47  ;;  %vm2615_vm0 = vmand %vm1857_vm12, %vm2542_vm1  ;;  %v856_v38 = vld [vmem:[#allocation3 + $0x48] sm:$0xff]  ;;  %v846_v23 = vld [vmem:[%s2380_s2] sm:$0xf]  ;;  %s1449_s2 = smov [#allocation9]  }
 0x263   :  { %v771_v2 = vsel %vm2615_vm0, %v767_v52, 0.0  ;;  %vm2616_vm11 = vmand %vm2608_vm9, %vm2541_vm8  ;;  %780 = vst [vmem:[#allocation3 + $0x70] sm:$0xf] %v776_v49  ;;  %v855_v53 = vld [vmem:[#allocation3 + $0x40] sm:$0xff]  ;;  %874 = vmatprep.subr.bf16.mxu0 %v856_v38  ;;  %s1168_s17 = sshll.u32 %s1449_s2, 4  ;;  %s1169_s17 = int_to_ptr.vmem [resolvable:$true] %s1168_s17 }
 0x264   :  { %v770_v20 = vsel %vm2616_vm11, %v768_v55, 0.0  ;;  %vm2618_vm10 = vmand %vm2609_vm3, %vm2617_vm7  ;;  %v775_v4 = vpack.c.bf16 %v771_v2, %v771_v2  ;;  %v858_v62 = vld [vmem:[#allocation3 + $0x58] sm:$0xff]  ;;  %875 = vmatpush1.bf16.msra.mxu0 %v855_v53  ;;  %s1408_s18 = scalar_lea.vmem %s1169_s17, 2048  ;;  %p1413_p3 = scmp.lt.s32.totalorder %s1169_s17, %s1169_s17 }
 0x265   :  { %v773_v44 = vsel %vm2618_vm10, %v769_v56, 0.0  ;;  %v774_v1 = vpack.c.bf16 %v770_v20, %v770_v20  ;;  %vm2620_vm8 = vmmov %vm2619_vm14  ;;  %915 = vmatprep.subr.bf16.mxu1 %v858_v62  ;;  %vm2635_vm14 = vcmp.eq.s32.totalorder %v1530_v32, 0  ;;  %p1409_p2 = scmp.ne.s32.totalorder %s1169_s17, %s1408_s18  ;;  %p1414_p4 = scmp.lt.s32.totalorder %s1408_s18, %s1408_s18 }
 0x266   :  { %v777_v63 = vpack.c.bf16 %v773_v44, %v773_v44  ;;  %779 = vst [vmem:[#allocation3 + $0x68] sm:$0xf] %v775_v4  ;;  %v827_v13 = vsel %vm2620_vm8, %v1356_v7, %v1360_v39  ;;  %vm2621_vm1 = vmmov %vm2620_vm8  ;;  %916 = vmatpush1.bf16.msra.mxu1 %v857_v48  ;;  %vm2636_vm8 = vcmp.eq.s32.totalorder %v1544_v37, 0 }
 0x267   :  { %778 = vst [vmem:[#allocation3 + $0x60] sm:$0xf] %v774_v1  ;;  %v828_v14 = vsel %vm2621_vm1, %v1355_v9, %v1356_v7  ;;  %vm2622_vm13 = vmmov %vm2621_vm1  ;;  %vm2637_vm1 = vcmp.lt.s32.totalorder %v1518_v21, 112  ;;  %p1415_p5 = por %p1414_p4, %p1413_p3 }
 0x268   :  { %781 = vst [vmem:[#allocation3 + $0x78] sm:$0xf] %v777_v63  ;;  %v829_v15 = vsel %vm2622_vm13, %v1361_v5, %v1355_v9  ;;  %vm2623_vm0 = vmand %vm2607_vm4, %vm2595_vm15  ;;  %vm2638_vm13 = vcmp.eq.s32.totalorder %v1527_v29, 15 }
 0x269   :  { %v832_v16 = vsel %vm2623_vm0, %v826_v54, 0.0  ;;  %vm2624_vm11 = vmand %vm1857_vm12, %vm2557_vm6  ;;  %vm2629_vm6 = vcmp.lt.s32.totalorder %v1518_v21, 16  ;;  %p1416_p6 = pnand %p1415_p5, %p1409_p2 }
 0x26a   :  { %v831_v18 = vsel %vm2624_vm11, %v827_v13, 0.0  ;;  %vm2625_vm7 = vmand %vm2608_vm9, %vm1756_vm5  ;;  %v836_v46 = vpack.c.bf16 %v832_v16, %v832_v16  ;;  %v861_v3 = vld [vmem:[#allocation3 + $0x70] sm:$0xff]  ;;  %vm2627_vm5 = vcmask 654336  }
 0x26b   :  { %v830_v19 = vsel %vm2625_vm7, %v828_v14, 0.0  ;;  %vm2626_vm10 = vmand %vm2609_vm3, %vm2559_vm2  ;;  %v835_v0 = vpack.c.bf16 %v831_v18, %v831_v18  ;;  %vm2630_vm2 = vcmp.eq.s32.totalorder %v1527_v29, 0  ;;  %vm2634_vm3 = vcmp.eq.s32.totalorder %v1542_v36, 0 }
 0x26c   :  { %v833_v8 = vsel %vm2626_vm10, %v829_v15, 0.0  ;;  %v834_v22 = vpack.c.bf16 %v830_v19, %v830_v19  ;;  %840 = vst [vmem:[#allocation3 + $0x90] sm:$0xf] %v836_v46  ;;  %vm2628_vm12 = vmmov %vm2627_vm5  ;;  %vm2641_vm7 = vcmp.eq.s32.totalorder %v1530_v32, 15  ;;  %vm2642_vm10 = vcmp.eq.s32.totalorder %v1544_v37, 15 }
 0x26d   :  { %v837_v17 = vpack.c.bf16 %v833_v8, %v833_v8  ;;  %839 = vst [vmem:[#allocation3 + $0x88] sm:$0xf] %v835_v0  ;;  %v860_v25 = vld [vmem:[#allocation3 + $0x68] sm:$0xff]  ;;  %vm2631_vm15 = vmmov %vm2629_vm6 }
 0x26e   :  { %838 = vst [vmem:[#allocation3 + $0x80] sm:$0xf] %v834_v22  ;;  %v859_v43 = vld [vmem:[#allocation3 + $0x60] sm:$0xff]  ;;  %876 = vmatprep.subr.bf16.mxu0 %v860_v25  ;;  %vm2632_vm4 = vmmov %vm2629_vm6 }
 0x26f   :  { %841 = vst [vmem:[#allocation3 + $0x98] sm:$0xf] %v837_v17  ;;  %v862_v57 = vld [vmem:[#allocation3 + $0x78] sm:$0xff]  ;;  %877 = vmatpush1.bf16.msra.mxu0 %v859_v43  ;;  %vm2633_vm9 = vmmov %vm2632_vm4 }
 0x270   :  { %917 = vmatprep.subr.bf16.mxu1 %v862_v57  ;;  %vm2639_vm0 = vmmov %vm2637_vm1 }
 0x271   :  { %918 = vmatpush1.bf16.msra.mxu1 %v861_v3  ;;  %vm2640_vm11 = vmmov %vm2639_vm0 }
 0x273   :  { %v865_v24 = vld [vmem:[#allocation3 + $0x90] sm:$0xff] }
 0x274   :  { %v864_v50 = vld [vmem:[#allocation3 + $0x88] sm:$0xff] }
 0x275   :  { %v863_v26 = vld [vmem:[#allocation3 + $0x80] sm:$0xff]  ;;  %878 = vmatprep.subr.bf16.mxu0 %v864_v50 }
 0x276   :  { %v866_v12 = vld [vmem:[#allocation3 + $0x98] sm:$0xff]  ;;  %879 = vmatpush1.bf16.msra.mxu0 %v863_v26 }
 0x277   :  { %919 = vmatprep.subr.bf16.mxu1 %v866_v12 }
 0x278   :  { %920 = vmatpush1.bf16.msra.mxu1 %v865_v24 }
 0x279   :  { %1184 = vmatmul.mubr.msk.bf16.vlgmr.msra.gmra.mrb[4].mxu0 %vm2627_vm5, %v846_v23  ;;  %vm2643_vm5 = vmmov %vm2639_vm0 }
 0x27b   :  { %1185 = vmatmul.mubr.msk.bf16.vlgmr.msra.gmra.mrb[4].mxu1 %vm2628_vm12, %v846_v23  ;;  %vm2644_vm12 = vcmp.eq.s32.totalorder %v1542_v36, 15 }
 0x34c   :  { %v904_v27 = vpop.f32.mrb[4].mxu0 }
 0x34d   :  { %v952_v28 = vmax.f32 %v904_v27, 0.0  ;;  %v906_v30 = vpop.f32.mrb[5].mxu0 }
 0x34e   :  { %v945_v42 = vpop.f32.mrb[4].mxu1  ;;  %v953_v33 = vmax.f32 %v906_v30, 0.0  ;;  %v908_v40 = vpop.f32.mrb[6].mxu0 }
 0x34f   :  { %v947_v31 = vpop.f32.mrb[5].mxu1  ;;  %v954_v51 = vmax.f32 %v945_v42, 0.0  ;;  %956 = vrot.lane.b32.xlu0 %v952_v28, %s1439_s9  ;;  %v909_v52 = vpop.f32.mrb[7].mxu0  ;;  %v1008_v62 = vmul.f32 0.75, %v952_v28 }
 0x350   :  { %v949_v47 = vpop.f32.mrb[6].mxu1  ;;  %v955_v56 = vmax.f32 %v947_v31, 0.0  ;;  %958 = vrot.lane.b32.xlu1 %v953_v33, %s1439_s9  ;;  %v1009_v44 = vmul.f32 0.75, %v953_v33 }
 0x351   :  { %v950_v55 = vpop.f32.mrb[7].mxu1  ;;  %v1010_v19 = vmul.f32 0.75, %v954_v51 }
 0x352   :  { %v1011_v53 = vmul.f32 0.75, %v955_v56 }
 0x353   :  { %960 = vrot.lane.b32.xlu0 %v954_v51, %s1439_s9 }
 0x354   :  { %962 = vrot.lane.b32.xlu1 %v955_v56, %s1439_s9 }
 0x357   :  { %980 = vrot.lane.b32.xlu0 %v952_v28, %s1443_s12 }
 0x358   :  { %982 = vrot.lane.b32.xlu1 %v953_v33, %s1443_s12 }
 0x35b   :  { %984 = vrot.lane.b32.xlu0 %v954_v51, %s1443_s12 }
 0x35c   :  { %986 = vrot.lane.b32.xlu1 %v955_v56, %s1443_s12 }
 0x3c1   :  { %v957_v58 = vpop.permute.xlu0 %956 }
 0x3c2   :  { %v959_v59 = vpop.permute.xlu1 %958 }
 0x3c3   :  { %v966_v60 = vsel %vm2629_vm6, %v957_v58, %v959_v59  ;;  %vm2645_vm6 = vcmp.lt.s32.totalorder %v1518_v21, 1 }
 0x3c4   :  { %v977_v2 = vsel %vm2630_vm2, %v953_v33, %v966_v60  ;;  %vm2646_vm2 = vmmov %vm2645_vm6 }
 0x3c5   :  { %v1005_v20 = vmul.f32 0.25, %v977_v2  ;;  %v961_v49 = vpop.permute.xlu0 %960 }
 0x3c6   :  { %v965_v4 = vsel %vm2631_vm15, %v959_v59, %v961_v49  ;;  %v963_v1 = vpop.permute.xlu1 %962  ;;  %vm2647_vm15 = vnez %v2439_v35 }
 0x3c7   :  { %v2204_v63 = vadd.f32 %v1009_v44, %v1005_v20  ;;  %v964_v5 = vsel %vm2632_vm4, %v961_v49, %v963_v1  ;;  %v967_v39 = vsel %vm2633_vm9, %v963_v1, %v957_v58  ;;  %v978_v7 = vsel %vm2634_vm3, %v954_v51, %v965_v4  ;;  %vm2649_vm9 = vmmov %vm2646_vm2 }
 0x3c8   :  { %v976_v9 = vsel %vm2635_vm14, %v952_v28, %v967_v39  ;;  %v979_v38 = vsel %vm2636_vm8, %v955_v56, %v964_v5  ;;  %v1006_v48 = vmul.f32 0.25, %v978_v7  ;;  %vm2648_vm4 = vnez %v2437_v34  ;;  %vm2650_vm3 = vmmov %vm2646_vm2 }
 0x3c9   :  { %v1004_v54 = vmul.f32 0.25, %v976_v9  ;;  %v1007_v13 = vmul.f32 0.25, %v979_v38  ;;  %v981_v14 = vpop.permute.xlu0 %980  ;;  %1026 = vrot.lane.b32.xlu1 %v2204_v63, %s1440_s1  ;;  %v1077_v52 = vmul.f32 0.75, %v2204_v63  ;;  %vm2651_vm14 = vnez %v2445_v41 }
 0x3ca   :  { %v983_v15 = vpop.permute.xlu1 %982  ;;  %v2228_v22 = vadd.f32 %v1010_v19, %v1006_v48  ;;  %vm2652_vm8 = vnez %v2453_v45 }
 0x3cb   :  { %v2218_v16 = vadd.f32 %v1008_v62, %v1004_v54  ;;  %v2220_v18 = vadd.f32 %v1011_v53, %v1007_v13  ;;  %v990_v25 = vsel %vm2639_vm0, %v981_v14, %v983_v15  ;;  %vm2655_vm0 = vnez %v2472_v10 }
 0x3cc   :  { %v1000_v3 = vsel %vm2641_vm7, %v952_v28, %v990_v25  ;;  %v1078_v1 = vmul.f32 0.75, %v2228_v22 }
 0x3cd   :  { %v985_v8 = vpop.permute.xlu0 %984  ;;  %1024 = vrot.lane.b32.xlu0 %v2218_v16, %s1440_s1  ;;  %1030 = vrot.lane.b32.xlu1 %v2220_v18, %s1440_s1  ;;  %v1016_v12 = vmul.f32 0.25, %v1000_v3  ;;  %v1076_v55 = vmul.f32 0.75, %v2218_v16  ;;  %v1079_v7 = vmul.f32 0.75, %v2220_v18 }
 0x3ce   :  { %v989_v46 = vsel %vm2637_vm1, %v983_v15, %v985_v8  ;;  %v987_v0 = vpop.permute.xlu1 %986  ;;  %vm2653_vm1 = vcmp.lt.s32.totalorder %v1518_v21, 127 }
 0x3cf   :  { %v1001_v17 = vsel %vm2638_vm13, %v953_v33, %v989_v46  ;;  %v991_v57 = vsel %vm2640_vm11, %v987_v0, %v981_v14  ;;  %v988_v50 = vsel %vm2643_vm5, %v985_v8, %v987_v0  ;;  %v2258_v37 = vadd.f32 %v1016_v12, %v1008_v62  ;;  %vm2654_vm13 = vmmov %vm2653_vm1 }
 0x3d0   :  { %v1017_v43 = vmul.f32 0.25, %v1001_v17  ;;  %v1003_v29 = vsel %vm2642_vm10, %v955_v56, %v991_v57  ;;  %v1002_v32 = vsel %vm2644_vm12, %v954_v51, %v988_v50  ;;  %vm2656_vm11 = vnez %v2463_v61  ;;  %vm2657_vm7 = vmmov %vm2653_vm1 }
 0x3d1   :  { %1028 = vrot.lane.b32.xlu0 %v2228_v22, %s1440_s1  ;;  %1050 = vrot.lane.b32.xlu1 %v2204_v63, %s1442_s11  ;;  %v1019_v24 = vmul.f32 0.25, %v1003_v29  ;;  %v1018_v23 = vmul.f32 0.25, %v1002_v32  ;;  %vm2658_vm10 = vmmov %vm2653_vm1  ;;  %vm2659_vm5 = vnez %v2467_v6  ;;  %vm2660_vm12 = vnez %v2474_v11 }
 0x3d2   :  { %v2250_v26 = vadd.f32 %v1017_v43, %v1009_v44 }
 0x3d3   :  { %v2260_v27 = vadd.f32 %v1019_v24, %v1011_v53  ;;  %v2266_v42 = vadd.f32 %v1018_v23, %v1010_v19 }
 0x3d5   :  { %1048 = vrot.lane.b32.xlu0 %v2218_v16, %s1442_s11  ;;  %1054 = vrot.lane.b32.xlu1 %v2220_v18, %s1442_s11 }
 0x3d9   :  { %1052 = vrot.lane.b32.xlu0 %v2228_v22, %s1442_s11  ;;  %1103 = vrot.lane.b32.xlu1 %v2250_v26, %s1440_s1 }
 0x3dd   :  { %1101 = vrot.lane.b32.xlu0 %v2258_v37, %s1440_s1  ;;  %1107 = vrot.lane.b32.xlu1 %v2260_v27, %s1440_s1 }
 0x3e1   :  { %1105 = vrot.lane.b32.xlu0 %v2266_v42, %s1440_s1  ;;  %1119 = vrot.lane.b32.xlu1 %v2250_v26, %s1442_s11 }
 0x3e5   :  { %1117 = vrot.lane.b32.xlu0 %v2258_v37, %s1442_s11  ;;  %1123 = vrot.lane.b32.xlu1 %v2260_v27, %s1442_s11 }
 0x3e9   :  { %1121 = vrot.lane.b32.xlu0 %v2266_v42, %s1442_s11 }
 0x43b   :  { %v1027_v36 = vpop.permute.xlu1 %1026 }
 0x43f   :  { %v1025_v28 = vpop.permute.xlu0 %1024  ;;  %v1031_v30 = vpop.permute.xlu1 %1030 }
 0x440   :  { %v1034_v31 = vsel %vm2645_vm6, %v1025_v28, %v1027_v36  ;;  %v1035_v33 = vsel %vm2646_vm2, %v1031_v30, %v1025_v28  ;;  %vm2661_vm6 = vmmov %vm2646_vm2  ;;  %v1138_v28 = vmul.f32 0.75, %v2250_v26 }
 0x441   :  { %v1045_v40 = vsel %vm2647_vm15, %v2204_v63, %v1034_v31  ;;  %v1044_v47 = vsel %vm2648_vm4, %v2218_v16, %v1035_v33 }
 0x442   :  { %v1073_v51 = vmul.f32 0.25, %v1045_v40  ;;  %v1072_v56 = vmul.f32 0.25, %v1044_v47 }
 0x443   :  { %v1029_v58 = vpop.permute.xlu0 %1028  ;;  %v1051_v59 = vpop.permute.xlu1 %1050 }
 0x444   :  { %v1081_v60 = vadd.f32 %v1077_v52, %v1073_v51  ;;  %v1080_v2 = vadd.f32 %v1076_v55, %v1072_v56  ;;  %v1032_v20 = vsel %vm2649_vm9, %v1029_v58, %v1031_v30  ;;  %v1033_v44 = vsel %vm2650_vm3, %v1027_v36, %v1029_v58  ;;  %vm2662_vm9 = vmmov %vm2646_vm2 }
 0x445   :  { %v1046_v49 = vsel %vm2651_vm14, %v2228_v22, %v1033_v44  ;;  %v1047_v4 = vsel %vm2652_vm8, %v2220_v18, %v1032_v20  ;;  %v1137_v30 = vmul.f32 0.75, %v2258_v37  ;;  %v1140_v56 = vmul.f32 0.75, %v2260_v27  ;;  %vm2665_vm3 = vmmov %vm2653_vm1 }
 0x446   :  { %1093 = vst [vmem:[#allocation9 + $0x8] sm:$0xff] %v1081_v60  ;;  %1092 = vst [vmem:[#allocation9] sm:$0xff] %v1080_v2  ;;  %v1074_v5 = vmul.f32 0.25, %v1046_v49  ;;  %v1075_v39 = vmul.f32 0.25, %v1047_v4  ;;  %v1139_v60 = vmul.f32 0.75, %v2266_v42 }
 0x447   :  { %v1049_v9 = vpop.permute.xlu0 %1048  ;;  %v1055_v38 = vpop.permute.xlu1 %1054 }
 0x448   :  { %v1082_v62 = vadd.f32 %v1078_v1, %v1074_v5  ;;  %v1083_v53 = vadd.f32 %v1079_v7, %v1075_v39  ;;  %v1058_v54 = vsel %vm2653_vm1, %v1049_v9, %v1051_v59  ;;  %v1059_v13 = vsel %vm2654_vm13, %v1055_v38, %v1049_v9 }
 0x449   :  { %v1068_v14 = vsel %vm2655_vm0, %v2218_v16, %v1058_v54  ;;  %v1071_v15 = vsel %vm2656_vm11, %v2220_v18, %v1059_v13 }
 0x44a   :  { %1094 = vst [vmem:[#allocation9 + $0x10] sm:$0xff] %v1082_v62  ;;  %1095 = vst [vmem:[#allocation9 + $0x18] sm:$0xff] %v1083_v53  ;;  %v1084_v48 = vmul.f32 0.25, %v1068_v14  ;;  %v1087_v19 = vmul.f32 0.25, %v1071_v15 }
 0x44b   :  { %v1053_v8 = vpop.permute.xlu0 %1052  ;;  %v1104_v46 = vpop.permute.xlu1 %1103 }
 0x44c   :  { %v1088_v0 = vadd.f32 %v1084_v48, %v1076_v55  ;;  %v1091_v17 = vadd.f32 %v1087_v19, %v1079_v7  ;;  %v1056_v25 = vsel %vm2657_vm7, %v1053_v8, %v1055_v38  ;;  %v1057_v57 = vsel %vm2658_vm10, %v1051_v59, %v1053_v8 }
 0x44d   :  { %v1069_v16 = vsel %vm2659_vm5, %v2204_v63, %v1057_v57  ;;  %v1070_v18 = vsel %vm2660_vm12, %v2228_v22, %v1056_v25 }
 0x44e   :  { %1097 = vst [vmem:[#allocation9 + $0x20] sm:$0xff] %v1088_v0  ;;  %1100 = vst [vmem:[#allocation9 + $0x38] sm:$0xff] %v1091_v17  ;;  %v1085_v43 = vmul.f32 0.25, %v1069_v16  ;;  %v1086_v3 = vmul.f32 0.25, %v1070_v18 }
 0x44f   :  { %v1102_v29 = vpop.permute.xlu0 %1101  ;;  %v1108_v50 = vpop.permute.xlu1 %1107 }
 0x450   :  { %v1089_v12 = vadd.f32 %v1085_v43, %v1077_v52  ;;  %v1090_v24 = vadd.f32 %v1086_v3, %v1078_v1  ;;  %v1111_v32 = vsel %vm2661_vm6, %v1102_v29, %v1104_v46  ;;  %v1112_v23 = vsel %vm2646_vm2, %v1108_v50, %v1102_v29 }
 0x451   :  { %v1114_v63 = vsel %vm2647_vm15, %v2250_v26, %v1111_v32  ;;  %v1113_v22 = vsel %vm2648_vm4, %v2258_v37, %v1112_v23  ;;  %vm2663_vm15 = vmmov %vm2646_vm2 }
 0x452   :  { %1098 = vst [vmem:[#allocation9 + $0x28] sm:$0xff] %v1089_v12  ;;  %1099 = vst [vmem:[#allocation9 + $0x30] sm:$0xff] %v1090_v24  ;;  %v1134_v36 = vmul.f32 0.25, %v1114_v63  ;;  %v1133_v31 = vmul.f32 0.25, %v1113_v22 }
 0x453   :  { %v1106_v33 = vpop.permute.xlu0 %1105  ;;  %v1120_v40 = vpop.permute.xlu1 %1119  ;;  %vm2664_vm4 = vmmov %vm2653_vm1 }
 0x454   :  { %v1142_v47 = vadd.f32 %v1138_v28, %v1134_v36  ;;  %v1141_v51 = vadd.f32 %v1137_v30, %v1133_v31  ;;  %v1109_v35 = vsel %vm2662_vm9, %v1106_v33, %v1108_v50  ;;  %v1110_v52 = vsel %vm2663_vm15, %v1104_v46, %v1106_v33 }
 0x455   :  { %v1115_v34 = vsel %vm2651_vm14, %v2266_v42, %v1110_v52  ;;  %v1116_v55 = vsel %vm2652_vm8, %v2260_v27, %v1109_v35  ;;  %vm2666_vm14 = vmmov %vm2653_vm1 }
 0x456   :  { %1155 = vst [vmem:[#allocation9 + $0x48] sm:$0xff] %v1142_v47  ;;  %1154 = vst [vmem:[#allocation9 + $0x40] sm:$0xff] %v1141_v51  ;;  %v1135_v58 = vmul.f32 0.25, %v1115_v34  ;;  %v1136_v59 = vmul.f32 0.25, %v1116_v55 }
 0x457   :  { %v1118_v2 = vpop.permute.xlu0 %1117  ;;  %v1124_v20 = vpop.permute.xlu1 %1123  ;;  %vm2667_vm8 = vmmov %vm2653_vm1 }
 0x458   :  { %v1143_v44 = vadd.f32 %v1139_v60, %v1135_v58  ;;  %v1144_v49 = vadd.f32 %v1140_v56, %v1136_v59  ;;  %v1127_v41 = vsel %vm2664_vm4, %v1118_v2, %v1120_v40  ;;  %v1128_v4 = vsel %vm2665_vm3, %v1124_v20, %v1118_v2 }
 0x459   :  { %v1129_v45 = vsel %vm2655_vm0, %v2258_v37, %v1127_v41  ;;  %v1132_v1 = vsel %vm2656_vm11, %v2260_v27, %v1128_v4 }
 0x45a   :  { %1156 = vst [vmem:[#allocation9 + $0x50] sm:$0xff] %v1143_v44  ;;  %1157 = vst [vmem:[#allocation9 + $0x58] sm:$0xff] %v1144_v49  ;;  %v1145_v5 = vmul.f32 0.25, %v1129_v45  ;;  %v1148_v39 = vmul.f32 0.25, %v1132_v1 }
 0x45b   :  { %v1122_v7 = vpop.permute.xlu0 %1121 }
 0x45c   :  { %v1149_v9 = vadd.f32 %v1145_v5, %v1137_v30  ;;  %v1152_v38 = vadd.f32 %v1148_v39, %v1140_v56  ;;  %v1125_v62 = vsel %vm2666_vm14, %v1122_v7, %v1124_v20  ;;  %v1126_v53 = vsel %vm2667_vm8, %v1120_v40, %v1122_v7 }
 0x45d   :  { %v1130_v10 = vsel %vm2659_vm5, %v2250_v26, %v1126_v53  ;;  %v1131_v61 = vsel %vm2660_vm12, %v2266_v42, %v1125_v62 }
 0x45e   :  { %1159 = vst [vmem:[#allocation9 + $0x60] sm:$0xff] %v1149_v9  ;;  %1162 = vst [vmem:[#allocation9 + $0x78] sm:$0xff] %v1152_v38  ;;  %v1146_v37 = vmul.f32 0.25, %v1130_v10  ;;  %v1147_v27 = vmul.f32 0.25, %v1131_v61 }
 0x460   :  { %v1150_v54 = vadd.f32 %v1146_v37, %v1138_v28  ;;  %v1151_v13 = vadd.f32 %v1147_v27, %v1139_v60 }
 0x462   :  { %1160 = vst [vmem:[#allocation9 + $0x68] sm:$0xff] %v1150_v54  ;;  %1161 = vst [vmem:[#allocation9 + $0x70] sm:$0xff] %v1151_v13 }
 0x463   :  { %1419 = shalt.err (!%p1416_p6)
}
 0x464   :  { %s1420_s21 = scalar_lea.hbm %s2381_s3, 2048 }
 0x465   :  { %p1421_p7 = scmp.ne.s32.totalorder %s2381_s3, %s1420_s21  ;;  %p1424_p8 = scmp.lt.u32.totalorder %s1420_s21, %s2381_s3 }
 0x467   :  { %p1426_p9 = pnand %p1424_p8, %p1421_p7 }
 0x469   :  { %1429 = shalt.err (!%p1426_p9)
}
 0x46a   :  { %s1450_s26 = smov 512   ;;  %s1451_s27 = smov 32  }
 0x46b   :  { %1174 = dma.vmem_to_hbm [thread:$0]  %s1169_s17, 2048, %s2381_s3, [#allocation6], %s1450_s26, %s1450_s26, %s1451_s27  }
 0x46c   :  { %1434 = dma.done.wait [#allocation6], 2048  }
 0x46d   :  { %1435 = vsyncadd [#allocation6], 4294965248 }
 0x46e   :  { %1178 = vsyncpa [#allocation5], 1 }
 0x46f   :  { %1179 = vsyncpa [#allocation8], 1 }
 0x470   :  { %1180 = vsyncpa [#allocation6], 1 }

</bundles_post_ra>
